<compile_context>
chip_gen: v5e
topology: v5e:2x2
jax: 0.10.0
libtpu: 0.0.40
codegen_flags: <defaults>
</compile_context>

<pallas_src>
import functools
from math import sqrt

import jax
import jax.numpy as jnp
from jax.experimental import pallas as pl
from jax.experimental.pallas import tpu as pltpu


# ---------------------------------------------------------------------------
# Glue: factorization + tensor-ring weight construction (plain JAX)
# ---------------------------------------------------------------------------
def factorint(n, multiple=True):
    """Prime factorization of n as a list, e.g. 8 -> [2, 2, 2]."""
    factors = []
    d = 2
    while n > 1:
        while n % d == 0:
            factors.append(d)
            n //= d
        d += 1
    return factors


def make_tr_cores(key, dims, ranks):
    """Tensor-ring cores: core_k has shape (ranks[k], dims[k], ranks[k+1 mod K])."""
    cores = []
    keys = jax.random.split(key, len(dims))
    for k, (n_k, kk) in enumerate(zip(dims, keys)):
        r_in = ranks[k]
        r_out = ranks[(k + 1) % len(dims)]
        scale = 1.0 / sqrt(float(n_k * r_in))
        cores.append(scale * jax.random.normal(kk, (r_in, n_k, r_out), jnp.float32))
    return cores


def tr_dense_weight(cores, in_dims, out_dims):
    """Contract ring cores into a dense weight (prod(in_dims), prod(out_dims))."""
    W = cores[0]  # (r0, n0, r1)
    for c in cores[1:]:
        W = jnp.tensordot(W, c, axes=[[-1], [0]])
    # W: (r0, n0, ..., n_{K-1}, r0) -> ring trace over the two rank axes.
    W = jnp.trace(W, axis1=0, axis2=-1)
    din = 1
    for d in in_dims:
        din *= d
    dout = 1
    for d in out_dims:
        dout *= d
    return W.reshape(din, dout)


# ---------------------------------------------------------------------------
# Pallas kernel: out = relu(x @ W1) @ W2
#   grid = (B tiles [parallel], N tiles [parallel], FF tiles [arbitrary])
#   The output block is resident across the FF reduction axis and used
#   directly as the f32 accumulator (no VMEM scratch).
# ---------------------------------------------------------------------------
def ffn_kernel(x_ref, w1_ref, w2_ref, o_ref):
    k = pl.program_id(2)

    # (tb, Din) @ (Din, tf) -> f32 (tb, tf) on the MXU.
    h = jnp.dot(x_ref[...], w1_ref[...], preferred_element_type=jnp.float32)
    h = jnp.maximum(h, 0.0).astype(w2_ref.dtype)   # relu; dropout = identity (eval)
    # (tb, tf) @ (tf, tn) -> f32 (tb, tn)
    partial = jnp.dot(h, w2_ref[...], preferred_element_type=jnp.float32)

    @pl.when(k == 0)
    def _():
        o_ref[...] = partial

    @pl.when(k != 0)
    def _():
        o_ref[...] += partial


@functools.partial(
    jax.jit, static_argnames=("tile_b", "tile_n", "tile_ff", "compute_dtype"))
def ffn_forward(x, w1, w2, tile_b=None, tile_n=None, tile_ff=None,
                compute_dtype=jnp.bfloat16):
    B, L, D = x.shape
    Din = L * D
    Dff = w1.shape[1]
    assert w1.shape == (Din, Dff) and w2.shape == (Dff, Din)

    # Pad batch to a sublane-friendly multiple of 8 (MXU M dim).  Padded rows
    # are zeros and stay zero through relu + matmul; they are sliced off.
    Bpad = max(8, ((B + 7) // 8) * 8)
    xf = jnp.zeros((Bpad, Din), x.dtype).at[:B].set(x.reshape(B, Din))

    # Tile defaults: whole problem in one grid step (grid = (1,1,1)).  For v7x
    # 2-TC sharding pass tile_n = Din // 2; for large batches pass tile_b.
    tb = tile_b or Bpad
    tn = tile_n or Din
    tf = tile_ff or Dff
    assert Bpad % tb == 0 and Din % tn == 0 and Dff % tf == 0
    assert tb % 8 == 0
    assert (tn == Din) or (tn % 128 == 0)
    assert (tf == Dff) or (tf % 128 == 0)

    # bf16 compute at the boundary; f32 accumulation inside the kernel.
    xc = xf.astype(compute_dtype)
    w1c = w1.astype(compute_dtype)
    w2c = w2.astype(compute_dtype)

    grid = (Bpad // tb, Din // tn, Dff // tf)

    out = pl.pallas_call(
        ffn_kernel,
        out_shape=jax.ShapeDtypeStruct((Bpad, Din), jnp.float32),
        grid_spec=pltpu.PrefetchScalarGridSpec(
            num_scalar_prefetch=0,
            grid=grid,
            in_specs=[
                pl.BlockSpec((tb, Din), lambda b, n, k: (b, 0)),   # x (resident over n, k)
                pl.BlockSpec((Din, tf), lambda b, n, k: (0, k)),   # W1 column tile
                pl.BlockSpec((tf, tn), lambda b, n, k: (k, n)),    # W2 tile
            ],
            out_specs=pl.BlockSpec((tb, tn), lambda b, n, k: (b, n)),
        ),
        compiler_params=pltpu.CompilerParams(
            dimension_semantics=("parallel", "parallel", "arbitrary")),
    )(xc, w1c, w2c)

    return out[:B].reshape(B, L, D).astype(x.dtype)


# ---------------------------------------------------------------------------
# Driver
# ---------------------------------------------------------------------------
if __name__ == "__main__":
    # Small shapes consistent with the module.
    B, seq_len, d_model, r = 2, 8, 32, 2
    d_ff = 4 * d_model  # 128

    input_size = factorint(seq_len, multiple=True) + [d_model]   # [2, 2, 2, 32]
    output_size = [seq_len, d_ff]                                # [8, 128]
    ranks = [r] * (len(input_size) + len(output_size))           # [2] * 6

    key = jax.random.PRNGKey(0)
    kx, k1, k2 = jax.random.split(key, 3)

    # conv1: TRLinear(input_size -> output_size); conv2: TRLinear(output_size -> input_size)
    cores1 = make_tr_cores(k1, input_size + output_size, ranks)
    cores2 = make_tr_cores(k2, output_size + input_size, ranks)
    W1 = tr_dense_weight(cores1, input_size, output_size)   # (L*D, L*d_ff) = (256, 1024)
    W2 = tr_dense_weight(cores2, output_size, input_size)   # (L*d_ff, L*D) = (1024, 256)

    x = jax.random.normal(kx, (B, seq_len, d_model), jnp.float32)

    out = ffn_forward(x, W1, W2)
    out = jax.block_until_ready(out)

    # Reference mirroring the kernel's bf16-input / f32-accumulate path.
    xb = x.reshape(B, seq_len * d_model).astype(jnp.bfloat16)
    w1b = W1.astype(jnp.bfloat16)
    w2b = W2.astype(jnp.bfloat16)
    h_ref = jnp.maximum(jnp.dot(xb, w1b, preferred_element_type=jnp.float32), 0.0)
    ref = jnp.dot(h_ref.astype(jnp.bfloat16), w2b,
                  preferred_element_type=jnp.float32).reshape(x.shape)

    assert out.shape == x.shape
    assert bool(jnp.allclose(out, ref, atol=2e-2, rtol=2e-2)), \
        float(jnp.max(jnp.abs(out - ref)))

    print("KERNEL_OK")
</pallas_src>

<mosaic_0001>
module attributes {stable_mosaic.version = 11 : i64} {
  func.func @ffn_kernel(%arg0: i32, %arg1: i32, %arg2: i32, %arg3: memref<8x256xbf16, #tpu.memory_space<vmem>>, %arg4: memref<256x1024xbf16, #tpu.memory_space<vmem>>, %arg5: memref<1024x256xbf16, #tpu.memory_space<vmem>>, %arg6: memref<8x256xf32, #tpu.memory_space<vmem>>) attributes {dimension_semantics = [#tpu.dimension_semantics<parallel>, #tpu.dimension_semantics<parallel>, #tpu.dimension_semantics<arbitrary>], iteration_bounds = array<i64: 1, 1, 1>, scalar_prefetch = 0 : i64, scratch_operands = 0 : i64, tpu.core_type = #tpu.core_type<tc>, window_params = [{transform_indices = @transform_0, window_bounds = array<i64: 8, 256>}, {transform_indices = @transform_1, window_bounds = array<i64: 256, 1024>}, {transform_indices = @transform_2, window_bounds = array<i64: 1024, 256>}, {transform_indices = @transform_3, window_bounds = array<i64: 8, 256>}]} {
    %c0 = arith.constant 0 : index
    %c0_0 = arith.constant 0 : index
    %0 = vector.load %arg3[%c0, %c0_0] : memref<8x256xbf16, #tpu.memory_space<vmem>>, vector<8x256xbf16>
    %c0_1 = arith.constant 0 : index
    %c0_2 = arith.constant 0 : index
    %1 = vector.load %arg4[%c0_1, %c0_2] : memref<256x1024xbf16, #tpu.memory_space<vmem>>, vector<256x1024xbf16>
    %cst = arith.constant dense<0.000000e+00> : vector<8x1024xf32>
    %2 = tpu.matmul %0, %1, %cst {dimension_numbers = #tpu.dot_dimension_numbers<[1], [0], [0], [1], [0, 0, 1, 1], [], []>} : vector<8x256xbf16>, vector<256x1024xbf16>, vector<8x1024xf32> -> vector<8x1024xf32>
    %cst_3 = arith.constant 0.000000e+00 : f32
    %3 = vector.broadcast %cst_3 : f32 to vector<8x1024xf32>
    %4 = arith.maximumf %2, %3 : vector<8x1024xf32>
    %5 = arith.truncf %4 : vector<8x1024xf32> to vector<8x1024xbf16>
    %c0_4 = arith.constant 0 : index
    %c0_5 = arith.constant 0 : index
    %6 = vector.load %arg5[%c0_4, %c0_5] : memref<1024x256xbf16, #tpu.memory_space<vmem>>, vector<1024x256xbf16>
    %cst_6 = arith.constant dense<0.000000e+00> : vector<8x256xf32>
    %7 = tpu.matmul %5, %6, %cst_6 {dimension_numbers = #tpu.dot_dimension_numbers<[1], [0], [0], [1], [0, 0, 1, 1], [], []>} : vector<8x1024xbf16>, vector<1024x256xbf16>, vector<8x256xf32> -> vector<8x256xf32>
    %c0_i32 = arith.constant 0 : i32
    %8 = arith.cmpi eq, %arg2, %c0_i32 : i32
    %9 = arith.extui %8 : i1 to i32
    %c0_i32_7 = arith.constant 0 : i32
    %10 = arith.cmpi ne, %9, %c0_i32_7 : i32
    scf.if %10 {
      %c0_10 = arith.constant 0 : index
      %c0_11 = arith.constant 0 : index
      %14 = vector.load %arg6[%c0_10, %c0_11] : memref<8x256xf32, #tpu.memory_space<vmem>>, vector<8x256xf32>
      tpu.vector_store %arg6[%c0_10, %c0_11], %7 {strides = array<i32>} : memref<8x256xf32, #tpu.memory_space<vmem>>, vector<8x256xf32>,
    } else {
    }
    %c0_i32_8 = arith.constant 0 : i32
    %11 = arith.cmpi ne, %arg2, %c0_i32_8 : i32
    %12 = arith.extui %11 : i1 to i32
    %c0_i32_9 = arith.constant 0 : i32
    %13 = arith.cmpi ne, %12, %c0_i32_9 : i32
    scf.if %13 {
      %c0_10 = arith.constant 0 : index
      %c0_11 = arith.constant 0 : index
      %14 = vector.load %arg6[%c0_10, %c0_11] : memref<8x256xf32, #tpu.memory_space<vmem>>, vector<8x256xf32>
      %15 = arith.addf %14, %7 : vector<8x256xf32>
      %c0_12 = arith.constant 0 : index
      %c0_13 = arith.constant 0 : index
      %16 = vector.load %arg6[%c0_12, %c0_13] : memref<8x256xf32, #tpu.memory_space<vmem>>, vector<8x256xf32>
      tpu.vector_store %arg6[%c0_12, %c0_13], %15 {strides = array<i32>} : memref<8x256xf32, #tpu.memory_space<vmem>>, vector<8x256xf32>,
    } else {
    }
    return
  }
  func.func @transform_0(%arg0: i32, %arg1: i32, %arg2: i32) -> (i32, i32) {
    %c0_i32 = arith.constant 0 : i32
    %c0_i32_0 = arith.constant 0 : i32
    return %arg0, %c0_i32 : i32, i32
  }
  func.func @transform_1(%arg0: i32, %arg1: i32, %arg2: i32) -> (i32, i32) {
    %c0_i32 = arith.constant 0 : i32
    %c0_i32_0 = arith.constant 0 : i32
    return %c0_i32, %arg2 : i32, i32
  }
  func.func @transform_2(%arg0: i32, %arg1: i32, %arg2: i32) -> (i32, i32) {
    %c0_i32 = arith.constant 0 : i32
    return %arg2, %arg1 : i32, i32
  }
  func.func @transform_3(%arg0: i32, %arg1: i32, %arg2: i32) -> (i32, i32) {
    %c0_i32 = arith.constant 0 : i32
    return %arg0, %arg1 : i32, i32
  }
}

</mosaic_0001>

<bundles_post_ra>
// kernel: ffn_forward.1
= control target key start
LH: loop header
LB: loop body
LE: loop exit
PB: predicated region body
PF: predicated region fallthrough
CT: control target
= control target key end

     0   :  { %s4903_s1 = inlined_call_operand.vmem [shape: bf16[256,1024], index: 1, kind: input, shape index: {}]   ;;  %s4904_s0 = inlined_call_operand.vmem [shape: bf16[8,256], index: 0, kind: input, shape index: {}]   ;;  %s4905_s2 = inlined_call_operand.vmem [shape: bf16[1024,256], index: 2, kind: input, shape index: {}]   ;;  %s4906_s3 = inlined_call_operand.vmem [shape: f32[8,256], index: 3, kind: output, shape index: {}]  }
   0x1   :  { %v2236_v0 = vld [vmem:[%s4903_s1 + $0x1c0] sm:$0xf]  ;;  %v3090_v5 = vld [vmem:[%s4903_s1 + $0x1c4] sm:$0xf] }
   0x2   :  { %v3094_v1 = vld [vmem:[%s4903_s1 + $0x1dc] sm:$0xf0]  ;;  %v2238_v6 = vld [vmem:[%s4903_s1 + $0x1e0] sm:$0xf0] }
   0x3   :  { %v2492_v2 = vld [vmem:[%s4903_s1 + $0x3c0] sm:$0xf]  ;;  %v2237_v3 = vor.u32 %v3094_v1, %v2236_v0  ;;  %v2241_v8 = vor.u32 %v3090_v5, %v2238_v6  ;;  %v3154_v9 = vld [vmem:[%s4903_s1 + $0x3c4] sm:$0xf] }
   0x4   :  { %v3158_v4 = vld [vmem:[%s4903_s1 + $0x3dc] sm:$0xf0]  ;;  %v2494_v10 = vld [vmem:[%s4903_s1 + $0x3e0] sm:$0xf0] }
   0x5   :  { %v2493_v7 = vor.u32 %v3158_v4, %v2492_v2  ;;  %v2204_v11 = vld [vmem:[%s4903_s1 + $0x180] sm:$0xf]  ;;  %790 = vmatpush.bf16.msra.mxu0 %v2237_v3  ;;  %v2497_v12 = vor.u32 %v3154_v9, %v2494_v10  ;;  %816 = vmatpush.bf16.msra.mxu2 %v2241_v8  ;;  %v3082_v18 = vld [vmem:[%s4903_s1 + $0x184] sm:$0xf] }
   0x6   :  { %v3086_v13 = vld [vmem:[%s4903_s1 + $0x19c] sm:$0xf0]  ;;  %v2206_v19 = vld [vmem:[%s4903_s1 + $0x1a0] sm:$0xf0] }
   0x7   :  { %v2460_v14 = vld [vmem:[%s4903_s1 + $0x380] sm:$0xf]  ;;  %803 = vmatpush.bf16.msra.mxu1 %v2493_v7  ;;  %v2205_v16 = vor.u32 %v3086_v13, %v2204_v11  ;;  %v3146_v20 = vld [vmem:[%s4903_s1 + $0x384] sm:$0xf]  ;;  %829 = vmatpush.bf16.msra.mxu3 %v2497_v12  ;;  %v2209_v21 = vor.u32 %v3082_v18, %v2206_v19 }
   0x8   :  { %v3150_v15 = vld [vmem:[%s4903_s1 + $0x39c] sm:$0xf0]  ;;  %v2462_v22 = vld [vmem:[%s4903_s1 + $0x3a0] sm:$0xf0] }
   0x9   :  { %v2461_v17 = vor.u32 %v3150_v15, %v2460_v14  ;;  %v2172_v23 = vld [vmem:[%s4903_s1 + $0x140] sm:$0xf]  ;;  %v2465_v25 = vor.u32 %v3146_v20, %v2462_v22  ;;  %v3074_v28 = vld [vmem:[%s4903_s1 + $0x144] sm:$0xf]  ;;  %791 = vmatpush.bf16.msra.mxu0 %v2205_v16  ;;  %817 = vmatpush.bf16.msra.mxu2 %v2209_v21 }
   0xa   :  { %v3078_v24 = vld [vmem:[%s4903_s1 + $0x15c] sm:$0xf0]  ;;  %v2174_v30 = vld [vmem:[%s4903_s1 + $0x160] sm:$0xf0] }
   0xb   :  { %v2428_v26 = vld [vmem:[%s4903_s1 + $0x340] sm:$0xf]  ;;  %v2173_v29 = vor.u32 %v3078_v24, %v2172_v23  ;;  %v3138_v31 = vld [vmem:[%s4903_s1 + $0x344] sm:$0xf]  ;;  %804 = vmatpush.bf16.msra.mxu1 %v2461_v17  ;;  %v2177_v34 = vor.u32 %v3074_v28, %v2174_v30  ;;  %830 = vmatpush.bf16.msra.mxu3 %v2465_v25  ;;  %v2244_v28 = vld [vmem:[%s4903_s1 + $0x1c8] sm:$0xf] }
   0xc   :  { %v3142_v27 = vld [vmem:[%s4903_s1 + $0x35c] sm:$0xf0]  ;;  %v2430_v32 = vld [vmem:[%s4903_s1 + $0x360] sm:$0xf0]  ;;  %v2500_v30 = vld [vmem:[%s4903_s1 + $0x3c8] sm:$0xf] }
   0xd   :  { %v2429_v33 = vor.u32 %v3142_v27, %v2428_v26  ;;  %v2140_v35 = vld [vmem:[%s4903_s1 + $0x100] sm:$0xf]  ;;  %v2433_v38 = vor.u32 %v3138_v31, %v2430_v32  ;;  %v3066_v40 = vld [vmem:[%s4903_s1 + $0x104] sm:$0xf]  ;;  %792 = vmatpush.bf16.msra.mxu0 %v2173_v29  ;;  %818 = vmatpush.bf16.msra.mxu2 %v2177_v34  ;;  %v3095_v29 = vld [vmem:[%s4903_s1 + $0x1e4] sm:$0xf0] }
   0xe   :  { %v3070_v36 = vld [vmem:[%s4903_s1 + $0x11c] sm:$0xf0]  ;;  %v2142_v41 = vld [vmem:[%s4903_s1 + $0x120] sm:$0xf0]  ;;  %v3159_v32 = vld [vmem:[%s4903_s1 + $0x3e4] sm:$0xf0] }
   0xf   :  { %v2396_v37 = vld [vmem:[%s4903_s1 + $0x300] sm:$0xf]  ;;  %v3130_v42 = vld [vmem:[%s4903_s1 + $0x304] sm:$0xf]  ;;  %v2141_v44 = vor.u32 %v3070_v36, %v2140_v35  ;;  %805 = vmatpush.bf16.msra.mxu1 %v2429_v33  ;;  %v2145_v46 = vor.u32 %v3066_v40, %v2142_v41  ;;  %831 = vmatpush.bf16.msra.mxu3 %v2433_v38  ;;  %v3091_v33 = vld [vmem:[%s4903_s1 + $0x1cc] sm:$0xf]  ;;  %v2245_v40 = vor.u32 %v3095_v29, %v2244_v28 }
  0x10   :  { %v3134_v39 = vld [vmem:[%s4903_s1 + $0x31c] sm:$0xf0]  ;;  %v2398_v43 = vld [vmem:[%s4903_s1 + $0x320] sm:$0xf0]  ;;  %v2246_v34 = vld [vmem:[%s4903_s1 + $0x1e8] sm:$0xf0]  ;;  %v2501_v41 = vor.u32 %v3159_v32, %v2500_v30 }
  0x11   :  { %v2397_v45 = vor.u32 %v3134_v39, %v2396_v37  ;;  %v2108_v47 = vld [vmem:[%s4903_s1 + $0xc0] sm:$0xf]  ;;  %v2401_v50 = vor.u32 %v3130_v42, %v2398_v43  ;;  %v3058_v52 = vld [vmem:[%s4903_s1 + $0xc4] sm:$0xf]  ;;  %793 = vmatpush.bf16.msra.mxu0 %v2141_v44  ;;  %819 = vmatpush.bf16.msra.mxu2 %v2145_v46  ;;  %v3155_v37 = vld [vmem:[%s4903_s1 + $0x3cc] sm:$0xf]  ;;  %v2249_v42 = vor.u32 %v3091_v33, %v2246_v34 }
  0x12   :  { %v3062_v48 = vld [vmem:[%s4903_s1 + $0xdc] sm:$0xf0]  ;;  %v2110_v53 = vld [vmem:[%s4903_s1 + $0xe0] sm:$0xf0]  ;;  %v2502_v38 = vld [vmem:[%s4903_s1 + $0x3e8] sm:$0xf0] }
  0x13   :  { %v2364_v49 = vld [vmem:[%s4903_s1 + $0x2c0] sm:$0xf]  ;;  %v3122_v54 = vld [vmem:[%s4903_s1 + $0x2c4] sm:$0xf]  ;;  %v2109_v56 = vor.u32 %v3062_v48, %v2108_v47  ;;  %806 = vmatpush.bf16.msra.mxu1 %v2397_v45  ;;  %v2113_v58 = vor.u32 %v3058_v52, %v2110_v53  ;;  %832 = vmatpush.bf16.msra.mxu3 %v2401_v50  ;;  %v2212_v43 = vld [vmem:[%s4903_s1 + $0x188] sm:$0xf]  ;;  %v2505_v46 = vor.u32 %v3155_v37, %v2502_v38 }
  0x14   :  { %v3126_v51 = vld [vmem:[%s4903_s1 + $0x2dc] sm:$0xf0]  ;;  %v2366_v55 = vld [vmem:[%s4903_s1 + $0x2e0] sm:$0xf0]  ;;  %v3087_v44 = vld [vmem:[%s4903_s1 + $0x1a4] sm:$0xf0] }
  0x15   :  { %v2365_v57 = vor.u32 %v3126_v51, %v2364_v49  ;;  %v2076_v59 = vld [vmem:[%s4903_s1 + $0x80] sm:$0xf]  ;;  %v2369_v62 = vor.u32 %v3122_v54, %v2366_v55  ;;  %v3050_v0 = vld [vmem:[%s4903_s1 + $0x84] sm:$0xf]  ;;  %794 = vmatpush.bf16.msra.mxu0 %v2109_v56  ;;  %820 = vmatpush.bf16.msra.mxu2 %v2113_v58  ;;  %v2468_v45 = vld [vmem:[%s4903_s1 + $0x388] sm:$0xf]  ;;  %v2213_v53 = vor.u32 %v3087_v44, %v2212_v43 }
  0x16   :  { %v3054_v60 = vld [vmem:[%s4903_s1 + $0x9c] sm:$0xf0]  ;;  %v2078_v1 = vld [vmem:[%s4903_s1 + $0xa0] sm:$0xf0]  ;;  %v3151_v47 = vld [vmem:[%s4903_s1 + $0x3a4] sm:$0xf0] }
  0x17   :  { %v2332_v61 = vld [vmem:[%s4903_s1 + $0x280] sm:$0xf]  ;;  %v3114_v2 = vld [vmem:[%s4903_s1 + $0x284] sm:$0xf]  ;;  %v2077_v4 = vor.u32 %v3054_v60, %v2076_v59  ;;  %807 = vmatpush.bf16.msra.mxu1 %v2365_v57  ;;  %v2081_v6 = vor.u32 %v3050_v0, %v2078_v1  ;;  %833 = vmatpush.bf16.msra.mxu3 %v2369_v62  ;;  %v3083_v48 = vld [vmem:[%s4903_s1 + $0x18c] sm:$0xf]  ;;  %v2469_v56 = vor.u32 %v3151_v47, %v2468_v45 }
  0x18   :  { %v3118_v63 = vld [vmem:[%s4903_s1 + $0x29c] sm:$0xf0]  ;;  %v2334_v3 = vld [vmem:[%s4903_s1 + $0x2a0] sm:$0xf0]  ;;  %v2214_v49 = vld [vmem:[%s4903_s1 + $0x1a8] sm:$0xf0] }
  0x19   :  { %v2333_v5 = vor.u32 %v3118_v63, %v2332_v61  ;;  %v2044_v7 = vld [vmem:[%s4903_s1 + $0x40] sm:$0xf]  ;;  %v2337_v10 = vor.u32 %v3114_v2, %v2334_v3  ;;  %v3042_v12 = vld [vmem:[%s4903_s1 + $0x44] sm:$0xf]  ;;  %795 = vmatpush.bf16.msra.mxu0 %v2077_v4  ;;  %821 = vmatpush.bf16.msra.mxu2 %v2081_v6  ;;  %v3147_v50 = vld [vmem:[%s4903_s1 + $0x38c] sm:$0xf]  ;;  %v2217_v57 = vor.u32 %v3083_v48, %v2214_v49 }
  0x1a   :  { %v3046_v8 = vld [vmem:[%s4903_s1 + $0x5c] sm:$0xf0]  ;;  %v2046_v13 = vld [vmem:[%s4903_s1 + $0x60] sm:$0xf0]  ;;  %v2470_v51 = vld [vmem:[%s4903_s1 + $0x3a8] sm:$0xf0] }
  0x1b   :  { %v2300_v9 = vld [vmem:[%s4903_s1 + $0x240] sm:$0xf]  ;;  %v3106_v14 = vld [vmem:[%s4903_s1 + $0x244] sm:$0xf]  ;;  %v2045_v16 = vor.u32 %v3046_v8, %v2044_v7  ;;  %808 = vmatpush.bf16.msra.mxu1 %v2333_v5  ;;  %v2049_v20 = vor.u32 %v3042_v12, %v2046_v13  ;;  %834 = vmatpush.bf16.msra.mxu3 %v2337_v10  ;;  %v2180_v58 = vld [vmem:[%s4903_s1 + $0x148] sm:$0xf]  ;;  %v2473_v61 = vor.u32 %v3147_v50, %v2470_v51 }
  0x1c   :  { %v3110_v11 = vld [vmem:[%s4903_s1 + $0x25c] sm:$0xf0]  ;;  %v2302_v15 = vld [vmem:[%s4903_s1 + $0x260] sm:$0xf0]  ;;  %v3079_v59 = vld [vmem:[%s4903_s1 + $0x164] sm:$0xf0] }
  0x1d   :  { %v2012_v17 = vld [vmem:[%s4903_s1] sm:$0xf]  ;;  %v2301_v19 = vor.u32 %v3110_v11, %v2300_v9  ;;  %v3034_v23 = vld [vmem:[%s4903_s1 + $0x4] sm:$0xf]  ;;  %v2305_v24 = vor.u32 %v3106_v14, %v2302_v15  ;;  %796 = vmatpush.bf16.msra.mxu0 %v2045_v16  ;;  %822 = vmatpush.bf16.msra.mxu2 %v2049_v20  ;;  %v2436_v60 = vld [vmem:[%s4903_s1 + $0x348] sm:$0xf]  ;;  %v2181_v5 = vor.u32 %v3079_v59, %v2180_v58 }
  0x1e   :  { %v3038_v18 = vld [vmem:[%s4903_s1 + $0x1c] sm:$0xf0]  ;;  %v2014_v25 = vld [vmem:[%s4903_s1 + $0x20] sm:$0xf0]  ;;  %v3143_v62 = vld [vmem:[%s4903_s1 + $0x364] sm:$0xf0] }
  0x1f   :  { %v2268_v21 = vld [vmem:[%s4903_s1 + $0x200] sm:$0xf]  ;;  %v3098_v26 = vld [vmem:[%s4903_s1 + $0x204] sm:$0xf]  ;;  %v2013_v31 = vor.u32 %v3038_v18, %v2012_v17  ;;  %809 = vmatpush.bf16.msra.mxu1 %v2301_v19  ;;  %v2017_v36 = vor.u32 %v3034_v23, %v2014_v25  ;;  %835 = vmatpush.bf16.msra.mxu3 %v2305_v24  ;;  %v3075_v63 = vld [vmem:[%s4903_s1 + $0x14c] sm:$0xf]  ;;  %v2437_v6 = vor.u32 %v3143_v62, %v2436_v60 }
  0x20   :  { %v3102_v22 = vld [vmem:[%s4903_s1 + $0x21c] sm:$0xf0]  ;;  %v2270_v27 = vld [vmem:[%s4903_s1 + $0x220] sm:$0xf0]  ;;  %v2182_v0 = vld [vmem:[%s4903_s1 + $0x168] sm:$0xf0] }
  0x21   :  { %v2269_v35 = vor.u32 %v3102_v22, %v2268_v21  ;;  %v2273_v39 = vor.u32 %v3098_v26, %v2270_v27  ;;  %797 = vmatpush.bf16.msra.mxu0 %v2013_v31  ;;  %823 = vmatpush.bf16.msra.mxu2 %v2017_v36  ;;  %v14_v52 = vld [vmem:[%s4904_s0] sm:$0xff]  ;;  %v3139_v3 = vld [vmem:[%s4903_s1 + $0x34c] sm:$0xf]  ;;  %v2185_v7 = vor.u32 %v3075_v63, %v2182_v0  ;;  %v2148_v8 = vld [vmem:[%s4903_s1 + $0x108] sm:$0xf] }
  0x22   :  { %v144_v54 = vunpack.c.l.b16 %v14_v52  ;;  %v145_v55 = vunpack.c.h.b16 %v14_v52  ;;  %v2438_v4 = vld [vmem:[%s4903_s1 + $0x368] sm:$0xf0]  ;;  %v3071_v9 = vld [vmem:[%s4903_s1 + $0x124] sm:$0xf0] }
  0x23   :  { %810 = vmatpush.bf16.msra.mxu1 %v2269_v35  ;;  %836 = vmatpush.bf16.msra.mxu3 %v2273_v39  ;;  %v2404_v10 = vld [vmem:[%s4903_s1 + $0x308] sm:$0xf]  ;;  %v2441_v11 = vor.u32 %v3139_v3, %v2438_v4  ;;  %v3067_v13 = vld [vmem:[%s4903_s1 + $0x10c] sm:$0xf]  ;;  %v2149_v17 = vor.u32 %v3071_v9, %v2148_v8  ;;  %v2252_v3 = vld [vmem:[%s4903_s1 + $0x1d0] sm:$0xf] }
  0x24   :  { %v3571_v1 = vpack.c.b16 %v144_v54, %v144_v54  ;;  %v3573_v2 = vpack.c.b16 %v145_v55, %v145_v55  ;;  %v3135_v12 = vld [vmem:[%s4903_s1 + $0x324] sm:$0xf0]  ;;  %v2150_v14 = vld [vmem:[%s4903_s1 + $0x128] sm:$0xf0]  ;;  %v3096_v4 = vld [vmem:[%s4903_s1 + $0x1ec] sm:$0xf0] }
  0x25   :  { %842 = vmatpush.bf16.msrb.mxu0 %v2245_v40  ;;  %868 = vmatpush.bf16.msrb.mxu2 %v2249_v42  ;;  %v3131_v15 = vld [vmem:[%s4903_s1 + $0x30c] sm:$0xf]  ;;  %v2405_v18 = vor.u32 %v3135_v12, %v2404_v10  ;;  %v2153_v19 = vor.u32 %v3067_v13, %v2150_v14  ;;  %v2116_v20 = vld [vmem:[%s4903_s1 + $0xc8] sm:$0xf]  ;;  %v3092_v8 = vld [vmem:[%s4903_s1 + $0x1d4] sm:$0xf] }
  0x26   :  { %811 = vmatmul.bf16.vlgmr.msra.gmra.mxu1 %v3573_v2  ;;  %798 = vmatmul.bf16.vlgmr.msra.gmra.mxu0 %v3571_v1  ;;  %v2406_v16 = vld [vmem:[%s4903_s1 + $0x328] sm:$0xf0]  ;;  %v3063_v21 = vld [vmem:[%s4903_s1 + $0xe4] sm:$0xf0]  ;;  %v2254_v9 = vld [vmem:[%s4903_s1 + $0x1f0] sm:$0xf0] }
  0x27   :  { %855 = vmatpush.bf16.msrb.mxu1 %v2501_v41  ;;  %881 = vmatpush.bf16.msrb.mxu3 %v2505_v46  ;;  %v2372_v22 = vld [vmem:[%s4903_s1 + $0x2c8] sm:$0xf]  ;;  %v2409_v23 = vor.u32 %v3131_v15, %v2406_v16  ;;  %v3059_v25 = vld [vmem:[%s4903_s1 + $0xcc] sm:$0xf]  ;;  %v2117_v29 = vor.u32 %v3063_v21, %v2116_v20  ;;  %v3156_v12 = vld [vmem:[%s4903_s1 + $0x3d4] sm:$0xf]  ;;  %v2253_v15 = vor.u32 %v3096_v4, %v2252_v3 }
  0x28   :  { %824 = vmatmul.bf16.vlgmr.msra.gmra.mxu2 %v3571_v1  ;;  %837 = vmatmul.bf16.vlgmr.msra.gmra.mxu3 %v3573_v2  ;;  %v3127_v24 = vld [vmem:[%s4903_s1 + $0x2e4] sm:$0xf0]  ;;  %v2118_v26 = vld [vmem:[%s4903_s1 + $0xe8] sm:$0xf0]  ;;  %v2510_v13 = vld [vmem:[%s4903_s1 + $0x3f0] sm:$0xf0] }
  0x29   :  { %843 = vmatpush.bf16.msrb.mxu0 %v2213_v53  ;;  %869 = vmatpush.bf16.msrb.mxu2 %v2217_v57  ;;  %v3123_v27 = vld [vmem:[%s4903_s1 + $0x2cc] sm:$0xf]  ;;  %v2373_v30 = vor.u32 %v3127_v24, %v2372_v22  ;;  %v2121_v31 = vor.u32 %v3059_v25, %v2118_v26  ;;  %v2084_v32 = vld [vmem:[%s4903_s1 + $0x88] sm:$0xf]  ;;  %v2476_v20 = vld [vmem:[%s4903_s1 + $0x390] sm:$0xf]  ;;  %v2513_v21 = vor.u32 %v3156_v12, %v2510_v13 }
  0x2a   :  { %v2374_v28 = vld [vmem:[%s4903_s1 + $0x2e8] sm:$0xf0]  ;;  %v3055_v33 = vld [vmem:[%s4903_s1 + $0xa4] sm:$0xf0]  ;;  %v3152_v22 = vld [vmem:[%s4903_s1 + $0x3ac] sm:$0xf0] }
  0x2b   :  { %856 = vmatpush.bf16.msrb.mxu1 %v2469_v56  ;;  %882 = vmatpush.bf16.msrb.mxu3 %v2473_v61  ;;  %v2340_v34 = vld [vmem:[%s4903_s1 + $0x288] sm:$0xf]  ;;  %v2377_v35 = vor.u32 %v3123_v27, %v2374_v28  ;;  %v3051_v37 = vld [vmem:[%s4903_s1 + $0x8c] sm:$0xf]  ;;  %v2085_v41 = vor.u32 %v3055_v33, %v2084_v32  ;;  %v2222_v24 = vld [vmem:[%s4903_s1 + $0x1b0] sm:$0xf0]  ;;  %v2477_v28 = vor.u32 %v3152_v22, %v2476_v20 }
  0x2c   :  { %v3119_v36 = vld [vmem:[%s4903_s1 + $0x2a4] sm:$0xf0]  ;;  %v2086_v38 = vld [vmem:[%s4903_s1 + $0xa8] sm:$0xf0]  ;;  %v3148_v25 = vld [vmem:[%s4903_s1 + $0x394] sm:$0xf] }
  0x2d   :  { %844 = vmatpush.bf16.msrb.mxu0 %v2181_v5  ;;  %870 = vmatpush.bf16.msrb.mxu2 %v2185_v7  ;;  %v3115_v39 = vld [vmem:[%s4903_s1 + $0x28c] sm:$0xf]  ;;  %v2341_v42 = vor.u32 %v3119_v36, %v2340_v34  ;;  %v2089_v43 = vor.u32 %v3051_v37, %v2086_v38  ;;  %v2052_v44 = vld [vmem:[%s4903_s1 + $0x48] sm:$0xf]  ;;  %v2508_v5 = vld [vmem:[%s4903_s1 + $0x3d0] sm:$0xf] }
  0x2e   :  { %v2342_v40 = vld [vmem:[%s4903_s1 + $0x2a8] sm:$0xf0]  ;;  %v3047_v45 = vld [vmem:[%s4903_s1 + $0x64] sm:$0xf0]  ;;  %v3160_v7 = vld [vmem:[%s4903_s1 + $0x3ec] sm:$0xf0] }
  0x2f   :  { %857 = vmatpush.bf16.msrb.mxu1 %v2437_v6  ;;  %883 = vmatpush.bf16.msrb.mxu3 %v2441_v11  ;;  %v2308_v46 = vld [vmem:[%s4903_s1 + $0x248] sm:$0xf]  ;;  %v2345_v47 = vor.u32 %v3115_v39, %v2342_v40  ;;  %v3043_v49 = vld [vmem:[%s4903_s1 + $0x4c] sm:$0xf]  ;;  %v2053_v53 = vor.u32 %v3047_v45, %v2052_v44  ;;  %v2509_v16 = vor.u32 %v3160_v7, %v2508_v5  ;;  %v2478_v26 = vld [vmem:[%s4903_s1 + $0x3b0] sm:$0xf0] }
  0x30   :  { %v3111_v48 = vld [vmem:[%s4903_s1 + $0x264] sm:$0xf0]  ;;  %v2054_v50 = vld [vmem:[%s4903_s1 + $0x68] sm:$0xf0]  ;;  %v2444_v32 = vld [vmem:[%s4903_s1 + $0x350] sm:$0xf]  ;;  %v2481_v33 = vor.u32 %v3148_v25, %v2478_v26 }
  0x31   :  { %845 = vmatpush.bf16.msrb.mxu0 %v2149_v17  ;;  %871 = vmatpush.bf16.msrb.mxu2 %v2153_v19  ;;  %v3107_v51 = vld [vmem:[%s4903_s1 + $0x24c] sm:$0xf]  ;;  %v2020_v54 = vld [vmem:[%s4903_s1 + $0x8] sm:$0xf]  ;;  %v2309_v56 = vor.u32 %v3111_v48, %v2308_v46  ;;  %v2057_v57 = vor.u32 %v3043_v49, %v2054_v50  ;;  %v2257_v17 = vor.u32 %v3092_v8, %v2254_v9  ;;  %v3088_v19 = vld [vmem:[%s4903_s1 + $0x1ac] sm:$0xf0] }
  0x32   :  { %v2310_v52 = vld [vmem:[%s4903_s1 + $0x268] sm:$0xf0]  ;;  %v3039_v55 = vld [vmem:[%s4903_s1 + $0x24] sm:$0xf0]  ;;  %v3144_v34 = vld [vmem:[%s4903_s1 + $0x36c] sm:$0xf0] }
  0x33   :  { %858 = vmatpush.bf16.msrb.mxu1 %v2405_v18  ;;  %884 = vmatpush.bf16.msrb.mxu3 %v2409_v23  ;;  %v2276_v58 = vld [vmem:[%s4903_s1 + $0x208] sm:$0xf]  ;;  %v3035_v60 = vld [vmem:[%s4903_s1 + $0xc] sm:$0xf]  ;;  %v2313_v61 = vor.u32 %v3107_v51, %v2310_v52  ;;  %v2021_v6 = vor.u32 %v3039_v55, %v2020_v54  ;;  %v2220_v18 = vld [vmem:[%s4903_s1 + $0x190] sm:$0xf]  ;;  %v2445_v40 = vor.u32 %v3144_v34, %v2444_v32 }
  0x34   :  { %v3103_v59 = vld [vmem:[%s4903_s1 + $0x224] sm:$0xf0]  ;;  %v2022_v62 = vld [vmem:[%s4903_s1 + $0x28] sm:$0xf0]  ;;  %v3084_v23 = vld [vmem:[%s4903_s1 + $0x194] sm:$0xf]  ;;  %v2221_v27 = vor.u32 %v3088_v19, %v2220_v18 }
  0x35   :  { %846 = vmatpush.bf16.msrb.mxu0 %v2117_v29  ;;  %872 = vmatpush.bf16.msrb.mxu2 %v2121_v31  ;;  %v3099_v63 = vld [vmem:[%s4903_s1 + $0x20c] sm:$0xf]  ;;  %v2277_v10 = vor.u32 %v3103_v59, %v2276_v58  ;;  %v2025_v11 = vor.u32 %v3035_v60, %v2022_v62  ;;  %v2225_v29 = vor.u32 %v3084_v23, %v2222_v24  ;;  %v3080_v31 = vld [vmem:[%s4903_s1 + $0x16c] sm:$0xf0]  ;;  %v2190_v36 = vld [vmem:[%s4903_s1 + $0x170] sm:$0xf0] }
  0x36   :  { %v2278_v0 = vld [vmem:[%s4903_s1 + $0x228] sm:$0xf0]  ;;  %v3140_v37 = vld [vmem:[%s4903_s1 + $0x354] sm:$0xf]  ;;  %v2412_v44 = vld [vmem:[%s4903_s1 + $0x310] sm:$0xf] }
  0x37   :  { %859 = vmatpush.bf16.msrb.mxu1 %v2373_v30  ;;  %885 = vmatpush.bf16.msrb.mxu3 %v2377_v35  ;;  %v2281_v14 = vor.u32 %v3099_v63, %v2278_v0  ;;  %v2188_v30 = vld [vmem:[%s4903_s1 + $0x150] sm:$0xf]  ;;  %v3076_v35 = vld [vmem:[%s4903_s1 + $0x154] sm:$0xf] }
  0x38   :  { %v2446_v38 = vld [vmem:[%s4903_s1 + $0x370] sm:$0xf0]  ;;  %v2189_v39 = vor.u32 %v3080_v31, %v2188_v30  ;;  %v3136_v46 = vld [vmem:[%s4903_s1 + $0x32c] sm:$0xf0] }
  0x39   :  { %847 = vmatpush.bf16.msrb.mxu0 %v2085_v41  ;;  %873 = vmatpush.bf16.msrb.mxu2 %v2089_v43  ;;  %v2193_v41 = vor.u32 %v3076_v35, %v2190_v36  ;;  %v3072_v43 = vld [vmem:[%s4903_s1 + $0x12c] sm:$0xf0]  ;;  %v2449_v45 = vor.u32 %v3140_v37, %v2446_v38  ;;  %v2158_v48 = vld [vmem:[%s4903_s1 + $0x130] sm:$0xf0]  ;;  %v2413_v52 = vor.u32 %v3136_v46, %v2412_v44  ;;  %v2260_v37 = vld [vmem:[%s4903_s1 + $0x1d8] sm:$0xf] }
  0x3a   :  { %v3132_v49 = vld [vmem:[%s4903_s1 + $0x314] sm:$0xf]  ;;  %v2124_v54 = vld [vmem:[%s4903_s1 + $0xd0] sm:$0xf]  ;;  %v3097_v38 = vld [vmem:[%s4903_s1 + $0x1f4] sm:$0xf0] }
  0x3b   :  { %860 = vmatpush.bf16.msrb.mxu1 %v2341_v42  ;;  %886 = vmatpush.bf16.msrb.mxu3 %v2345_v47  ;;  %v2156_v42 = vld [vmem:[%s4903_s1 + $0x110] sm:$0xf]  ;;  %v3068_v47 = vld [vmem:[%s4903_s1 + $0x114] sm:$0xf]  ;;  %v3157_v46 = vld [vmem:[%s4903_s1 + $0x3dc] sm:$0xf] }
  0x3c   :  { %v2414_v50 = vld [vmem:[%s4903_s1 + $0x330] sm:$0xf0]  ;;  %v2157_v51 = vor.u32 %v3072_v43, %v2156_v42  ;;  %v3064_v55 = vld [vmem:[%s4903_s1 + $0xec] sm:$0xf0]  ;;  %v3093_v42 = vld [vmem:[%s4903_s1 + $0x1dc] sm:$0xf] }
  0x3d   :  { %848 = vmatpush.bf16.msrb.mxu0 %v2053_v53  ;;  %874 = vmatpush.bf16.msrb.mxu2 %v2057_v57  ;;  %v2161_v53 = vor.u32 %v3068_v47, %v2158_v48  ;;  %v2417_v57 = vor.u32 %v3132_v49, %v2414_v50  ;;  %v3128_v58 = vld [vmem:[%s4903_s1 + $0x2ec] sm:$0xf0]  ;;  %v3060_v59 = vld [vmem:[%s4903_s1 + $0xd4] sm:$0xf]  ;;  %v2125_v63 = vor.u32 %v3064_v55, %v2124_v54  ;;  %v2262_v43 = vld [vmem:[%s4903_s1 + $0x1f8] sm:$0xf0] }
  0x3e   :  { %v2126_v60 = vld [vmem:[%s4903_s1 + $0xf0] sm:$0xf0]  ;;  %v2092_v4 = vld [vmem:[%s4903_s1 + $0x90] sm:$0xf]  ;;  %v2518_v47 = vld [vmem:[%s4903_s1 + $0x3f8] sm:$0xf0]  ;;  %v2261_v49 = vor.u32 %v3097_v38, %v2260_v37 }
  0x3f   :  { %861 = vmatpush.bf16.msrb.mxu1 %v2309_v56  ;;  %887 = vmatpush.bf16.msrb.mxu3 %v2313_v61  ;;  %v2380_v56 = vld [vmem:[%s4903_s1 + $0x2d0] sm:$0xf]  ;;  %v3124_v61 = vld [vmem:[%s4903_s1 + $0x2d4] sm:$0xf]  ;;  %v2129_v3 = vor.u32 %v3060_v59, %v2126_v60  ;;  %v2484_v54 = vld [vmem:[%s4903_s1 + $0x398] sm:$0xf]  ;;  %v2521_v55 = vor.u32 %v3157_v46, %v2518_v47 }
  0x40   :  { %v2382_v62 = vld [vmem:[%s4903_s1 + $0x2f0] sm:$0xf0]  ;;  %v2381_v0 = vor.u32 %v3128_v58, %v2380_v56  ;;  %v3056_v5 = vld [vmem:[%s4903_s1 + $0xac] sm:$0xf0]  ;;  %v3153_v56 = vld [vmem:[%s4903_s1 + $0x3b4] sm:$0xf0] }
  0x41   :  { %849 = vmatpush.bf16.msrb.mxu0 %v2021_v6  ;;  %875 = vmatpush.bf16.msrb.mxu2 %v2025_v11  ;;  %v2348_v6 = vld [vmem:[%s4903_s1 + $0x290] sm:$0xf]  ;;  %v2385_v7 = vor.u32 %v3124_v61, %v2382_v62  ;;  %v3052_v9 = vld [vmem:[%s4903_s1 + $0x94] sm:$0xf]  ;;  %v2093_v13 = vor.u32 %v3056_v5, %v2092_v4  ;;  %v2230_v58 = vld [vmem:[%s4903_s1 + $0x1b8] sm:$0xf0]  ;;  %v2485_v62 = vor.u32 %v3153_v56, %v2484_v54 }
  0x42   :  { %v3120_v8 = vld [vmem:[%s4903_s1 + $0x2ac] sm:$0xf0]  ;;  %v3116_v11 = vld [vmem:[%s4903_s1 + $0x294] sm:$0xf]  ;;  %v3149_v59 = vld [vmem:[%s4903_s1 + $0x39c] sm:$0xf] }
  0x43   :  { %862 = vmatpush.bf16.msrb.mxu1 %v2277_v10  ;;  %888 = vmatpush.bf16.msrb.mxu3 %v2281_v14  ;;  %v2094_v10 = vld [vmem:[%s4903_s1 + $0xb0] sm:$0xf0]  ;;  %v2349_v14 = vor.u32 %v3120_v8, %v2348_v6  ;;  %v2316_v18 = vld [vmem:[%s4903_s1 + $0x250] sm:$0xf]  ;;  %v2486_v60 = vld [vmem:[%s4903_s1 + $0x3b8] sm:$0xf0] }
  0x44   :  { %850 = vmatmul.bf16.vlgmr.msrb.gmra.mxu0 %v3571_v1  ;;  %876 = vmatmul.bf16.vlgmr.msrb.gmra.mxu2 %v3571_v1  ;;  %v2350_v12 = vld [vmem:[%s4903_s1 + $0x2b0] sm:$0xf0]  ;;  %v3112_v20 = vld [vmem:[%s4903_s1 + $0x26c] sm:$0xf0]  ;;  %v2452_v4 = vld [vmem:[%s4903_s1 + $0x358] sm:$0xf]  ;;  %v2489_v5 = vor.u32 %v3149_v59, %v2486_v60 }
  0x45   :  { %894 = vmatpush.bf16.msra.mxu0 %v2253_v15  ;;  %920 = vmatpush.bf16.msra.mxu2 %v2257_v17  ;;  %v2097_v15 = vor.u32 %v3052_v9, %v2094_v10  ;;  %v3048_v17 = vld [vmem:[%s4903_s1 + $0x6c] sm:$0xf0]  ;;  %v2353_v19 = vor.u32 %v3116_v11, %v2350_v12  ;;  %v2062_v22 = vld [vmem:[%s4903_s1 + $0x70] sm:$0xf0]  ;;  %v3145_v6 = vld [vmem:[%s4903_s1 + $0x374] sm:$0xf0] }
  0x46   :  { %863 = vmatmul.bf16.vlgmr.msrb.gmra.mxu1 %v3573_v2  ;;  %889 = vmatmul.bf16.vlgmr.msrb.gmra.mxu3 %v3573_v2  ;;  %v3108_v23 = vld [vmem:[%s4903_s1 + $0x254] sm:$0xf]  ;;  %v2028_v26 = vld [vmem:[%s4903_s1 + $0x10] sm:$0xf]  ;;  %v2198_v8 = vld [vmem:[%s4903_s1 + $0x178] sm:$0xf0]  ;;  %v2453_v12 = vor.u32 %v3145_v6, %v2452_v4 }
  0x47   :  { %907 = vmatpush.bf16.msra.mxu1 %v2509_v16  ;;  %933 = vmatpush.bf16.msra.mxu3 %v2513_v21  ;;  %v2060_v16 = vld [vmem:[%s4903_s1 + $0x50] sm:$0xf]  ;;  %v3044_v21 = vld [vmem:[%s4903_s1 + $0x54] sm:$0xf]  ;;  %v3141_v9 = vld [vmem:[%s4903_s1 + $0x35c] sm:$0xf] }
  0x48   :  { %v2318_v24 = vld [vmem:[%s4903_s1 + $0x270] sm:$0xf0]  ;;  %v2061_v25 = vor.u32 %v3048_v17, %v2060_v16  ;;  %v2284_v30 = vld [vmem:[%s4903_s1 + $0x210] sm:$0xf]  ;;  %v2454_v10 = vld [vmem:[%s4903_s1 + $0x378] sm:$0xf0] }
  0x49   :  { %895 = vmatpush.bf16.msra.mxu0 %v2221_v27  ;;  %921 = vmatpush.bf16.msra.mxu2 %v2225_v29  ;;  %v3040_v27 = vld [vmem:[%s4903_s1 + $0x2c] sm:$0xf0]  ;;  %v2065_v29 = vor.u32 %v3044_v21, %v2062_v22  ;;  %v3036_v32 = vld [vmem:[%s4903_s1 + $0x14] sm:$0xf]  ;;  %v2420_v16 = vld [vmem:[%s4903_s1 + $0x318] sm:$0xf]  ;;  %v2457_v17 = vor.u32 %v3141_v9, %v2454_v10 }
  0x4a   :  { %v3104_v31 = vld [vmem:[%s4903_s1 + $0x22c] sm:$0xf0]  ;;  %v2030_v34 = vld [vmem:[%s4903_s1 + $0x30] sm:$0xf0]  ;;  %v3133_v21 = vld [vmem:[%s4903_s1 + $0x31c] sm:$0xf] }
  0x4b   :  { %908 = vmatpush.bf16.msra.mxu1 %v2477_v28  ;;  %934 = vmatpush.bf16.msra.mxu3 %v2481_v33  ;;  %v2317_v28 = vor.u32 %v3112_v20, %v2316_v18  ;;  %v2321_v33 = vor.u32 %v3108_v23, %v2318_v24  ;;  %v3100_v35 = vld [vmem:[%s4903_s1 + $0x214] sm:$0xf]  ;;  %v2285_v44 = vor.u32 %v3104_v31, %v2284_v30  ;;  %v3137_v18 = vld [vmem:[%s4903_s1 + $0x334] sm:$0xf0]  ;;  %v2166_v20 = vld [vmem:[%s4903_s1 + $0x138] sm:$0xf0] }
  0x4c   :  { %v2286_v36 = vld [vmem:[%s4903_s1 + $0x230] sm:$0xf0]  ;;  %v2422_v22 = vld [vmem:[%s4903_s1 + $0x338] sm:$0xf0]  ;;  %v2421_v24 = vor.u32 %v3137_v18, %v2420_v16  ;;  %v3129_v30 = vld [vmem:[%s4903_s1 + $0x2f4] sm:$0xf0] }
  0x4d   :  { %896 = vmatpush.bf16.msra.mxu0 %v2189_v39  ;;  %922 = vmatpush.bf16.msra.mxu2 %v2193_v41  ;;  %v2516_v39 = vld [vmem:[%s4903_s1 + $0x3d8] sm:$0xf]  ;;  %v2289_v48 = vor.u32 %v3100_v35, %v2286_v36  ;;  %v3061_v31 = vld [vmem:[%s4903_s1 + $0xdc] sm:$0xf]  ;;  %v2580_v9 = vld [vmem:[%s4905_s2 + $0x70] sm:$0xf] }
  0x4e   :  { %v3161_v41 = vld [vmem:[%s4903_s1 + $0x3f4] sm:$0xf0]  ;;  %v2358_v46 = vld [vmem:[%s4903_s1 + $0x2b8] sm:$0xf0]  ;;  %v2708_v18 = vld [vmem:[%s4905_s2 + $0x170] sm:$0xf] }
  0x4f   :  { %909 = vmatpush.bf16.msra.mxu1 %v2445_v40  ;;  %935 = vmatpush.bf16.msra.mxu3 %v2449_v45  ;;  %v2029_v40 = vor.u32 %v3040_v27, %v2028_v26  ;;  %v2033_v45 = vor.u32 %v3036_v32, %v2030_v34  ;;  %v2517_v50 = vor.u32 %v3161_v41, %v2516_v39  ;;  %v2132_v26 = vld [vmem:[%s4903_s1 + $0xd8] sm:$0xf]  ;;  %v2134_v32 = vld [vmem:[%s4903_s1 + $0xf8] sm:$0xf0] }
  0x50   :  { %v3065_v27 = vld [vmem:[%s4903_s1 + $0xf4] sm:$0xf0]  ;;  %v2390_v34 = vld [vmem:[%s4903_s1 + $0x2f8] sm:$0xf0]  ;;  %v2137_v37 = vor.u32 %v3061_v31, %v2134_v32  ;;  %v2564_v32 = vld [vmem:[%s4905_s2 + $0x50] sm:$0xf] }
  0x51   :  { %897 = vmatpush.bf16.msra.mxu0 %v2157_v51  ;;  %923 = vmatpush.bf16.msra.mxu2 %v2161_v53  ;;  %v2265_v51 = vor.u32 %v3093_v42, %v2262_v43  ;;  %v3089_v53 = vld [vmem:[%s4903_s1 + $0x1b4] sm:$0xf0]  ;;  %v2133_v35 = vor.u32 %v3065_v27, %v2132_v26  ;;  %v3053_v43 = vld [vmem:[%s4903_s1 + $0x9c] sm:$0xf] }
  0x52   :  { %v2100_v38 = vld [vmem:[%s4903_s1 + $0x98] sm:$0xf]  ;;  %v2070_v56 = vld [vmem:[%s4903_s1 + $0x78] sm:$0xf0] }
  0x53   :  { %910 = vmatpush.bf16.msra.mxu1 %v2413_v52  ;;  %936 = vmatpush.bf16.msra.mxu3 %v2417_v57  ;;  %v2228_v52 = vld [vmem:[%s4903_s1 + $0x198] sm:$0xf]  ;;  %v3085_v57 = vld [vmem:[%s4903_s1 + $0x19c] sm:$0xf] }
  0x54   :  { %v2229_v61 = vor.u32 %v3089_v53, %v2228_v52  ;;  %v3057_v39 = vld [vmem:[%s4903_s1 + $0xb4] sm:$0xf0]  ;;  %v2038_v6 = vld [vmem:[%s4903_s1 + $0x38] sm:$0xf0] }
  0x55   :  { %898 = vmatpush.bf16.msra.mxu0 %v2125_v63  ;;  %924 = vmatpush.bf16.msra.mxu2 %v2129_v3  ;;  %v2233_v63 = vor.u32 %v3085_v57, %v2230_v58  ;;  %v3081_v3 = vld [vmem:[%s4903_s1 + $0x174] sm:$0xf0]  ;;  %v2101_v47 = vor.u32 %v3057_v39, %v2100_v38  ;;  %v3109_v57 = vld [vmem:[%s4903_s1 + $0x25c] sm:$0xf]  ;;  %v3171_v39 = vld [vmem:[%s4905_s2 + $0x44] sm:$0xf0] }
  0x56   :  { %v3121_v42 = vld [vmem:[%s4903_s1 + $0x2b4] sm:$0xf0]  ;;  %v2326_v58 = vld [vmem:[%s4903_s1 + $0x278] sm:$0xf0] }
  0x57   :  { %911 = vmatpush.bf16.msra.mxu1 %v2381_v0  ;;  %937 = vmatpush.bf16.msra.mxu3 %v2385_v7  ;;  %v2196_v0 = vld [vmem:[%s4903_s1 + $0x158] sm:$0xf]  ;;  %v3077_v7 = vld [vmem:[%s4903_s1 + $0x15c] sm:$0xf]  ;;  %v2329_v4 = vor.u32 %v3109_v57, %v2326_v58  ;;  %v2532_v57 = vld [vmem:[%s4905_s2 + $0x10] sm:$0xf] }
  0x58   :  { %v2197_v11 = vor.u32 %v3081_v3, %v2196_v0  ;;  %v2324_v52 = vld [vmem:[%s4903_s1 + $0x258] sm:$0xf] }
  0x59   :  { %899 = vmatpush.bf16.msra.mxu0 %v2093_v13  ;;  %925 = vmatpush.bf16.msra.mxu2 %v2097_v15  ;;  %v2201_v13 = vor.u32 %v3077_v7, %v2198_v8  ;;  %v3073_v15 = vld [vmem:[%s4903_s1 + $0x134] sm:$0xf0]  ;;  %v3101_v7 = vld [vmem:[%s4903_s1 + $0x21c] sm:$0xf] }
  0x5a   :  { %v3113_v54 = vld [vmem:[%s4903_s1 + $0x274] sm:$0xf0]  ;;  %v2294_v8 = vld [vmem:[%s4903_s1 + $0x238] sm:$0xf0] }
  0x5b   :  { %912 = vmatpush.bf16.msra.mxu1 %v2349_v14  ;;  %938 = vmatpush.bf16.msra.mxu3 %v2353_v19  ;;  %v2164_v14 = vld [vmem:[%s4903_s1 + $0x118] sm:$0xf]  ;;  %v3069_v19 = vld [vmem:[%s4903_s1 + $0x11c] sm:$0xf]  ;;  %v2297_v16 = vor.u32 %v3101_v7, %v2294_v8  ;;  %v2524_v7 = vld [vmem:[%s4905_s2] sm:$0xf] }
  0x5c   :  { %v2165_v23 = vor.u32 %v3073_v15, %v2164_v14  ;;  %v2036_v60 = vld [vmem:[%s4903_s1 + $0x18] sm:$0xf] }
  0x5d   :  { %900 = vmatpush.bf16.msra.mxu0 %v2061_v25  ;;  %926 = vmatpush.bf16.msra.mxu2 %v2065_v29  ;;  %v2169_v25 = vor.u32 %v3069_v19, %v2166_v20  ;;  %v2425_v29 = vor.u32 %v3133_v21, %v2422_v22  ;;  %v2292_v0 = vld [vmem:[%s4903_s1 + $0x218] sm:$0xf]  ;;  %v2572_v20 = vld [vmem:[%s4905_s2 + $0x60] sm:$0xf]  ;;  %v3175_v21 = vld [vmem:[%s4905_s2 + $0x64] sm:$0xf0] }
  0x5e   :  { %v3105_v3 = vld [vmem:[%s4903_s1 + $0x234] sm:$0xf0] }
  0x5f   :  { %913 = vmatpush.bf16.msra.mxu1 %v2317_v28  ;;  %939 = vmatpush.bf16.msra.mxu3 %v2321_v33  ;;  %v2388_v28 = vld [vmem:[%s4903_s1 + $0x2d8] sm:$0xf]  ;;  %v3125_v33 = vld [vmem:[%s4903_s1 + $0x2dc] sm:$0xf]  ;;  %v2293_v14 = vor.u32 %v3105_v3, %v2292_v0  ;;  %v2684_v0 = vld [vmem:[%s4905_s2 + $0x140] sm:$0xf] }
  0x60   :  { %v2389_v36 = vor.u32 %v3129_v30, %v2388_v28  ;;  %v2393_v41 = vor.u32 %v3125_v33, %v2390_v34  ;;  %v3177_v10 = vld [vmem:[%s4905_s2 + $0x74] sm:$0xf0]  ;;  %v2573_v28 = vor.u32 %v3175_v21, %v2572_v20  ;;  %v3207_v30 = vld [vmem:[%s4905_s2 + $0x164] sm:$0xf0]  ;;  %v2900_v20 = vld [vmem:[%s4905_s2 + $0x2f0] sm:$0xf] }
  0x61   :  { %901 = vmatpush.bf16.msra.mxu0 %v2029_v40  ;;  %927 = vmatpush.bf16.msra.mxu2 %v2033_v45  ;;  %v2356_v40 = vld [vmem:[%s4903_s1 + $0x298] sm:$0xf]  ;;  %v3117_v45 = vld [vmem:[%s4903_s1 + $0x29c] sm:$0xf]  ;;  %v3203_v3 = vld [vmem:[%s4905_s2 + $0x144] sm:$0xf0] }
  0x62   :  { %v2361_v53 = vor.u32 %v3117_v45, %v2358_v46  ;;  %v3209_v19 = vld [vmem:[%s4905_s2 + $0x174] sm:$0xf0]  ;;  %v2612_v46 = vld [vmem:[%s4905_s2 + $0xb0] sm:$0xf] }
  0x63   :  { %914 = vmatpush.bf16.msra.mxu1 %v2285_v44  ;;  %940 = vmatpush.bf16.msra.mxu3 %v2289_v48  ;;  %v2102_v44 = vld [vmem:[%s4903_s1 + $0xb8] sm:$0xf0]  ;;  %v2357_v48 = vor.u32 %v3121_v42, %v2356_v40  ;;  %v3225_v26 = vld [vmem:[%s4905_s2 + $0x1f4] sm:$0xf0]  ;;  %v2709_v27 = vor.u32 %v3209_v19, %v2708_v18  ;;  %v2676_v18 = vld [vmem:[%s4905_s2 + $0x130] sm:$0xf] }
  0x64   :  { %902 = vmatmul.bf16.vlgmr.msra.gmra.mxu0 %v3571_v1  ;;  %928 = vmatmul.bf16.vlgmr.msra.gmra.mxu2 %v3571_v1  ;;  %v3173_v33 = vld [vmem:[%s4905_s2 + $0x54] sm:$0xf0] }
  0x65   :  { %946 = vmatpush.bf16.msrb.mxu0 %v2261_v49  ;;  %972 = vmatpush.bf16.msrb.mxu2 %v2265_v51  ;;  %v2105_v49 = vor.u32 %v3053_v43, %v2102_v44  ;;  %v3049_v51 = vld [vmem:[%s4903_s1 + $0x74] sm:$0xf0]  ;;  %v2565_v38 = vor.u32 %v3173_v33, %v2564_v32  ;;  %v2548_v43 = vld [vmem:[%s4905_s2 + $0x30] sm:$0xf]  ;;  %v3239_v32 = vld [vmem:[%s4905_s2 + $0x264] sm:$0xf0] }
  0x66   :  { %915 = vmatmul.bf16.vlgmr.msra.gmra.mxu1 %v3573_v2  ;;  %941 = vmatmul.bf16.vlgmr.msra.gmra.mxu3 %v3573_v2  ;;  %v3169_v44 = vld [vmem:[%s4905_s2 + $0x34] sm:$0xf0] }
  0x67   :  { %959 = vmatpush.bf16.msrb.mxu1 %v2517_v50  ;;  %985 = vmatpush.bf16.msrb.mxu3 %v2521_v55  ;;  %v2068_v50 = vld [vmem:[%s4903_s1 + $0x58] sm:$0xf]  ;;  %v3045_v55 = vld [vmem:[%s4903_s1 + $0x5c] sm:$0xf] }
  0x68   :  { %v2069_v59 = vor.u32 %v3049_v51, %v2068_v50  ;;  %v3167_v50 = vld [vmem:[%s4905_s2 + $0x24] sm:$0xf0]  ;;  %v3201_v19 = vld [vmem:[%s4905_s2 + $0x134] sm:$0xf0] }
  0x69   :  { %947 = vmatpush.bf16.msrb.mxu0 %v2229_v61  ;;  %973 = vmatpush.bf16.msrb.mxu2 %v2233_v63  ;;  %v2325_v61 = vor.u32 %v3113_v54, %v2324_v52  ;;  %v3041_v63 = vld [vmem:[%s4903_s1 + $0x34] sm:$0xf0]  ;;  %v2604_v52 = vld [vmem:[%s4905_s2 + $0xa0] sm:$0xf]  ;;  %v2692_v54 = vld [vmem:[%s4905_s2 + $0x150] sm:$0xf] }
  0x6a   :  { %v3257_v21 = vld [vmem:[%s4905_s2 + $0x2f4] sm:$0xf0] }
  0x6b   :  { %960 = vmatpush.bf16.msrb.mxu1 %v2485_v62  ;;  %986 = vmatpush.bf16.msrb.mxu3 %v2489_v5  ;;  %v2073_v62 = vor.u32 %v3045_v55, %v2070_v56  ;;  %v3037_v5 = vld [vmem:[%s4903_s1 + $0x1c] sm:$0xf]  ;;  %v3205_v55 = vld [vmem:[%s4905_s2 + $0x154] sm:$0xf0]  ;;  %v2901_v33 = vor.u32 %v3257_v21, %v2900_v20  ;;  %v2716_v20 = vld [vmem:[%s4905_s2 + $0x180] sm:$0xf] }
  0x6c   :  { %v2041_v15 = vor.u32 %v3037_v5, %v2038_v6  ;;  %v2693_v58 = vor.u32 %v3205_v55, %v2692_v54  ;;  %v3181_v5 = vld [vmem:[%s4905_s2 + $0x94] sm:$0xf0]  ;;  %v2685_v6 = vor.u32 %v3203_v3, %v2684_v0  ;;  %v2732_v54 = vld [vmem:[%s4905_s2 + $0x1a0] sm:$0xf]  ;;  %v3215_v55 = vld [vmem:[%s4905_s2 + $0x1a4] sm:$0xf0] }
  0x6d   :  { %948 = vmatpush.bf16.msrb.mxu0 %v2197_v11  ;;  %974 = vmatpush.bf16.msrb.mxu2 %v2201_v13  ;;  %v2037_v11 = vor.u32 %v3041_v63, %v2036_v60  ;;  %v3193_v13 = vld [vmem:[%s4905_s2 + $0xf4] sm:$0xf0]  ;;  %v3223_v60 = vld [vmem:[%s4905_s2 + $0x1e4] sm:$0xf0] }
  0x6e   :  { %v3195_v0 = vld [vmem:[%s4905_s2 + $0x104] sm:$0xf0] }
  0x6f   :  { %961 = vmatpush.bf16.msrb.mxu1 %v2453_v12  ;;  %987 = vmatpush.bf16.msrb.mxu3 %v2457_v17  ;;  %v2644_v12 = vld [vmem:[%s4905_s2 + $0xf0] sm:$0xf]  ;;  %v2581_v17 = vor.u32 %v3177_v10, %v2580_v9  ;;  %v3163_v9 = vld [vmem:[%s4905_s2 + $0x4] sm:$0xf0] }
  0x70   :  { %v2645_v22 = vor.u32 %v3193_v13, %v2644_v12  ;;  %v2836_v10 = vld [vmem:[%s4905_s2 + $0x270] sm:$0xf]  ;;  %v2588_v13 = vld [vmem:[%s4905_s2 + $0x80] sm:$0xf]  ;;  %v3211_v21 = vld [vmem:[%s4905_s2 + $0x184] sm:$0xf0] }
  0x71   :  { %949 = vmatpush.bf16.msrb.mxu0 %v2165_v23  ;;  %975 = vmatpush.bf16.msrb.mxu2 %v2169_v25  ;;  %v2636_v23 = vld [vmem:[%s4905_s2 + $0xe0] sm:$0xf]  ;;  %v2772_v25 = vld [vmem:[%s4905_s2 + $0x1f0] sm:$0xf] }
  0x72   :  { %v2773_v31 = vor.u32 %v3225_v26, %v2772_v25  ;;  %v3219_v25 = vld [vmem:[%s4905_s2 + $0x1c4] sm:$0xf0] }
  0x73   :  { %962 = vmatpush.bf16.msrb.mxu1 %v2421_v24  ;;  %988 = vmatpush.bf16.msrb.mxu3 %v2425_v29  ;;  %v3191_v24 = vld [vmem:[%s4905_s2 + $0xe4] sm:$0xf0]  ;;  %v2700_v29 = vld [vmem:[%s4905_s2 + $0x160] sm:$0xf] }
  0x74   :  { %v2637_v34 = vor.u32 %v3191_v24, %v2636_v23  ;;  %v2748_v23 = vld [vmem:[%s4905_s2 + $0x1c0] sm:$0xf]  ;;  %v2525_v24 = vor.u32 %v3163_v9, %v2524_v7  ;;  %v3213_v7 = vld [vmem:[%s4905_s2 + $0x194] sm:$0xf0] }
  0x75   :  { %950 = vmatpush.bf16.msrb.mxu0 %v2133_v35  ;;  %976 = vmatpush.bf16.msrb.mxu2 %v2137_v37  ;;  %v2628_v35 = vld [vmem:[%s4905_s2 + $0xd0] sm:$0xf]  ;;  %v2701_v37 = vor.u32 %v3207_v30, %v2700_v29  ;;  %v2749_v29 = vor.u32 %v3219_v25, %v2748_v23  ;;  %v2668_v30 = vld [vmem:[%s4905_s2 + $0x120] sm:$0xf] }
  0x76   :  { %v2796_v9 = vld [vmem:[%s4905_s2 + $0x220] sm:$0xf]  ;;  %v2788_v23 = vld [vmem:[%s4905_s2 + $0x210] sm:$0xf] }
  0x77   :  { %963 = vmatpush.bf16.msrb.mxu1 %v2389_v36  ;;  %989 = vmatpush.bf16.msrb.mxu3 %v2393_v41  ;;  %v3189_v36 = vld [vmem:[%s4905_s2 + $0xd4] sm:$0xf0]  ;;  %v2620_v41 = vld [vmem:[%s4905_s2 + $0xc0] sm:$0xf] }
  0x78   :  { %v2629_v40 = vor.u32 %v3189_v36, %v2628_v35  ;;  %v2740_v35 = vld [vmem:[%s4905_s2 + $0x1b0] sm:$0xf]  ;;  %v3217_v36 = vld [vmem:[%s4905_s2 + $0x1b4] sm:$0xf0] }
  0x79   :  { %951 = vmatpush.bf16.msrb.mxu0 %v2101_v47  ;;  %977 = vmatpush.bf16.msrb.mxu2 %v2105_v49  ;;  %v3185_v47 = vld [vmem:[%s4905_s2 + $0xb4] sm:$0xf0]  ;;  %v2540_v49 = vld [vmem:[%s4905_s2 + $0x20] sm:$0xf] }
  0x7a   :  { %v2613_v51 = vor.u32 %v3185_v47, %v2612_v46  ;;  %v2541_v56 = vor.u32 %v3167_v50, %v2540_v49  ;;  %v3235_v46 = vld [vmem:[%s4905_s2 + $0x244] sm:$0xf0]  ;;  %v2660_v50 = vld [vmem:[%s4905_s2 + $0x110] sm:$0xf] }
  0x7b   :  { %964 = vmatpush.bf16.msrb.mxu1 %v2357_v48  ;;  %990 = vmatpush.bf16.msrb.mxu3 %v2361_v53  ;;  %v2549_v48 = vor.u32 %v3169_v44, %v2548_v43  ;;  %v3183_v53 = vld [vmem:[%s4905_s2 + $0xa4] sm:$0xf0]  ;;  %v3253_v43 = vld [vmem:[%s4905_s2 + $0x2d4] sm:$0xf0] }
  0x7c   :  { %v3251_v49 = vld [vmem:[%s4905_s2 + $0x2c4] sm:$0xf0] }
  0x7d   :  { %952 = vmatpush.bf16.msrb.mxu0 %v2069_v59  ;;  %978 = vmatpush.bf16.msrb.mxu2 %v2073_v62  ;;  %v2764_v59 = vld [vmem:[%s4905_s2 + $0x1e0] sm:$0xf]  ;;  %v2605_v62 = vor.u32 %v3183_v53, %v2604_v52 }
  0x7e   :  { %v2765_v63 = vor.u32 %v3223_v60, %v2764_v59  ;;  %v2868_v59 = vld [vmem:[%s4905_s2 + $0x2b0] sm:$0xf]  ;;  %v2733_v60 = vor.u32 %v3215_v55, %v2732_v54 }
  0x7f   :  { %965 = vmatpush.bf16.msrb.mxu1 %v2325_v61  ;;  %991 = vmatpush.bf16.msrb.mxu3 %v2329_v4  ;;  %v3165_v61 = vld [vmem:[%s4905_s2 + $0x14] sm:$0xf0]  ;;  %v2596_v4 = vld [vmem:[%s4905_s2 + $0x90] sm:$0xf] }
  0x80   :  { %v2533_v8 = vor.u32 %v3165_v61, %v2532_v57  ;;  %v2597_v12 = vor.u32 %v3181_v5, %v2596_v4  ;;  %v3233_v57 = vld [vmem:[%s4905_s2 + $0x234] sm:$0xf0] }
  0x81   :  { %953 = vmatpush.bf16.msrb.mxu0 %v2037_v11  ;;  %979 = vmatpush.bf16.msrb.mxu2 %v2041_v15  ;;  %v3241_v11 = vld [vmem:[%s4905_s2 + $0x274] sm:$0xf0] }
  0x82   :  { %v3221_v15 = vld [vmem:[%s4905_s2 + $0x1d4] sm:$0xf0]  ;;  %v2837_v26 = vor.u32 %v3241_v11, %v2836_v10  ;;  %v3231_v10 = vld [vmem:[%s4905_s2 + $0x224] sm:$0xf0] }
  0x83   :  { %966 = vmatpush.bf16.msrb.mxu1 %v2293_v14  ;;  %992 = vmatpush.bf16.msrb.mxu3 %v2297_v16  ;;  %v2756_v14 = vld [vmem:[%s4905_s2 + $0x1d0] sm:$0xf]  ;;  %v3179_v16 = vld [vmem:[%s4905_s2 + $0x84] sm:$0xf0] }
  0x84   :  { %954 = vmatmul.bf16.vlgmr.msrb.gmra.mxu0 %v3571_v1  ;;  %980 = vmatmul.bf16.vlgmr.msrb.gmra.mxu2 %v3571_v1  ;;  %v2556_v1 = vld [vmem:[%s4905_s2 + $0x40] sm:$0xf] }
  0x85   :  { %1782 = vmatpush.bf16.msra.mxu0 %v2581_v17  ;;  %1808 = vmatpush.bf16.msra.mxu2 %v2709_v27  ;;  %v2557_v42 = vor.u32 %v3171_v39, %v2556_v1  ;;  %v2757_v17 = vor.u32 %v3221_v15, %v2756_v14  ;;  %v2828_v27 = vld [vmem:[%s4905_s2 + $0x260] sm:$0xf]  ;;  %v2741_v1 = vor.u32 %v3217_v36, %v2740_v35  ;;  %v3247_v14 = vld [vmem:[%s4905_s2 + $0x2a4] sm:$0xf0]  ;;  %v2964_v15 = vld [vmem:[%s4905_s2 + $0x370] sm:$0xf] }
  0x86   :  { %967 = vmatmul.bf16.vlgmr.msrb.gmra.mxu1 %v3573_v2  ;;  %993 = vmatmul.bf16.vlgmr.msrb.gmra.mxu3 %v3573_v2  ;;  %v3187_v2 = vld [vmem:[%s4905_s2 + $0xc4] sm:$0xf0]  ;;  %v2829_v39 = vor.u32 %v3239_v32, %v2828_v27  ;;  %v2717_v27 = vor.u32 %v3211_v21, %v2716_v20  ;;  %v2630_v20 = vld [vmem:[%s4905_s2 + $0xd8] sm:$0xf0] }
  0x87   :  { %1795 = vmatpush.bf16.msra.mxu1 %v2645_v22  ;;  %1821 = vmatpush.bf16.msra.mxu3 %v2773_v31  ;;  %v2621_v45 = vor.u32 %v3187_v2, %v2620_v41  ;;  %v2677_v22 = vor.u32 %v3201_v19, %v2676_v18  ;;  %v3199_v31 = vld [vmem:[%s4905_s2 + $0x124] sm:$0xf0]  ;;  %v3237_v41 = vld [vmem:[%s4905_s2 + $0x254] sm:$0xf0]  ;;  %v2797_v19 = vor.u32 %v3231_v10, %v2796_v9  ;;  %v2932_v10 = vld [vmem:[%s4905_s2 + $0x330] sm:$0xf] }
  0x88   :  { %v3227_v35 = vld [vmem:[%s4905_s2 + $0x204] sm:$0xf0] }
  0x89   :  { %1783 = vmatpush.bf16.msra.mxu0 %v2573_v28  ;;  %1809 = vmatpush.bf16.msra.mxu2 %v2701_v37  ;;  %v2589_v28 = vor.u32 %v3179_v16, %v2588_v13  ;;  %v2892_v37 = vld [vmem:[%s4905_s2 + $0x2e0] sm:$0xf]  ;;  %v3273_v16 = vld [vmem:[%s4905_s2 + $0x374] sm:$0xf0] }
  0x8a   :  { %v2965_v18 = vor.u32 %v3273_v16, %v2964_v15  ;;  %v3172_v15 = vld [vmem:[%s4905_s2 + $0x54] sm:$0xf]  ;;  %v2566_v16 = vld [vmem:[%s4905_s2 + $0x58] sm:$0xf0] }
  0x8b   :  { %1796 = vmatpush.bf16.msra.mxu1 %v2637_v34  ;;  %1822 = vmatpush.bf16.msra.mxu3 %v2765_v63  ;;  %v2669_v34 = vor.u32 %v3199_v31, %v2668_v30  ;;  %v2652_v63 = vld [vmem:[%s4905_s2 + $0x100] sm:$0xf]  ;;  %v3271_v31 = vld [vmem:[%s4905_s2 + $0x364] sm:$0xf0] }
  0x8c   :  { %v2653_v3 = vor.u32 %v3195_v0, %v2652_v63  ;;  %v2956_v30 = vld [vmem:[%s4905_s2 + $0x360] sm:$0xf]  ;;  %v2574_v63 = vld [vmem:[%s4905_s2 + $0x68] sm:$0xf0] }
  0x8d   :  { %1784 = vmatpush.bf16.msra.mxu0 %v2565_v38  ;;  %1810 = vmatpush.bf16.msra.mxu2 %v2693_v58  ;;  %v3255_v38 = vld [vmem:[%s4905_s2 + $0x2e4] sm:$0xf0]  ;;  %v2957_v36 = vor.u32 %v3271_v31, %v2956_v30  ;;  %v3186_v30 = vld [vmem:[%s4905_s2 + $0xc4] sm:$0xf]  ;;  %v2622_v31 = vld [vmem:[%s4905_s2 + $0xc8] sm:$0xf0] }
  0x8e   :  { %v2893_v2 = vor.u32 %v3255_v38, %v2892_v37 }
  0x8f   :  { %1797 = vmatpush.bf16.msra.mxu1 %v2629_v40  ;;  %1823 = vmatpush.bf16.msra.mxu3 %v2757_v17  ;;  %v2820_v40 = vld [vmem:[%s4905_s2 + $0x250] sm:$0xf] }
  0x90   :  { %v2821_v44 = vor.u32 %v3237_v41, %v2820_v40  ;;  %v2582_v40 = vld [vmem:[%s4905_s2 + $0x78] sm:$0xf0]  ;;  %v3028_v41 = vld [vmem:[%s4905_s2 + $0x3f0] sm:$0xf] }
  0x91   :  { %1785 = vmatpush.bf16.msra.mxu0 %v2557_v42  ;;  %1811 = vmatpush.bf16.msra.mxu2 %v2685_v6  ;;  %v2884_v42 = vld [vmem:[%s4905_s2 + $0x2d0] sm:$0xf] }
  0x92   :  { %v2885_v47 = vor.u32 %v3253_v43, %v2884_v42  ;;  %v2724_v6 = vld [vmem:[%s4905_s2 + $0x190] sm:$0xf]  ;;  %v2844_v43 = vld [vmem:[%s4905_s2 + $0x280] sm:$0xf] }
  0x93   :  { %1798 = vmatpush.bf16.msra.mxu1 %v2621_v45  ;;  %1824 = vmatpush.bf16.msra.mxu3 %v2749_v29  ;;  %v2812_v45 = vld [vmem:[%s4905_s2 + $0x240] sm:$0xf]  ;;  %v2725_v13 = vor.u32 %v3213_v7, %v2724_v6  ;;  %v3245_v29 = vld [vmem:[%s4905_s2 + $0x294] sm:$0xf0] }
  0x94   :  { %v2813_v53 = vor.u32 %v3235_v46, %v2812_v45  ;;  %v2948_v45 = vld [vmem:[%s4905_s2 + $0x350] sm:$0xf]  ;;  %v3269_v46 = vld [vmem:[%s4905_s2 + $0x354] sm:$0xf0] }
  0x95   :  { %1786 = vmatpush.bf16.msra.mxu0 %v2549_v48  ;;  %1812 = vmatpush.bf16.msra.mxu2 %v2677_v22  ;;  %v2876_v48 = vld [vmem:[%s4905_s2 + $0x2c0] sm:$0xf] }
  0x96   :  { %v2877_v58 = vor.u32 %v3251_v49, %v2876_v48  ;;  %v3243_v48 = vld [vmem:[%s4905_s2 + $0x284] sm:$0xf0]  ;;  %v3192_v49 = vld [vmem:[%s4905_s2 + $0xf4] sm:$0xf] }
  0x97   :  { %1799 = vmatpush.bf16.msra.mxu1 %v2613_v51  ;;  %1825 = vmatpush.bf16.msra.mxu3 %v2741_v1  ;;  %v3197_v51 = vld [vmem:[%s4905_s2 + $0x114] sm:$0xf0] }
  0x98   :  { %v2661_v52 = vor.u32 %v3197_v51, %v2660_v50  ;;  %v2949_v50 = vor.u32 %v3269_v46, %v2948_v45  ;;  %v2646_v51 = vld [vmem:[%s4905_s2 + $0xf8] sm:$0xf0]  ;;  %v2988_v45 = vld [vmem:[%s4905_s2 + $0x3a0] sm:$0xf]  ;;  %v3279_v46 = vld [vmem:[%s4905_s2 + $0x3a4] sm:$0xf0] }
  0x99   :  { %1787 = vmatpush.bf16.msra.mxu0 %v2541_v56  ;;  %1813 = vmatpush.bf16.msra.mxu2 %v2669_v34  ;;  %v2804_v56 = vld [vmem:[%s4905_s2 + $0x230] sm:$0xf]  ;;  %v2780_v34 = vld [vmem:[%s4905_s2 + $0x200] sm:$0xf]  ;;  %v2649_v0 = vor.u32 %v3192_v49, %v2646_v51  ;;  %v2542_v49 = vld [vmem:[%s4905_s2 + $0x28] sm:$0xf0] }
  0x9a   :  { %v2805_v5 = vor.u32 %v3233_v57, %v2804_v56  ;;  %v2781_v55 = vor.u32 %v3227_v35, %v2780_v34  ;;  %v2940_v57 = vld [vmem:[%s4905_s2 + $0x340] sm:$0xf]  ;;  %v3168_v35 = vld [vmem:[%s4905_s2 + $0x34] sm:$0xf] }
  0x9b   :  { %1800 = vmatpush.bf16.msra.mxu1 %v2605_v62  ;;  %v3249_v62 = vld [vmem:[%s4905_s2 + $0x2b4] sm:$0xf0]  ;;  %1826 = vmatpush.bf16.msra.mxu3 %v2733_v60  ;;  %v3174_v60 = vld [vmem:[%s4905_s2 + $0x64] sm:$0xf] }
  0x9c   :  { %v2869_v11 = vor.u32 %v3249_v62, %v2868_v59  ;;  %v3012_v62 = vld [vmem:[%s4905_s2 + $0x3d0] sm:$0xf] }
  0x9d   :  { %1788 = vmatpush.bf16.msra.mxu0 %v2533_v8  ;;  %1814 = vmatpush.bf16.msra.mxu2 %v2661_v52  ;;  %v3020_v52 = vld [vmem:[%s4905_s2 + $0x3e0] sm:$0xf] }
  0x9f   :  { %1801 = vmatpush.bf16.msra.mxu1 %v2597_v12  ;;  %v2860_v12 = vld [vmem:[%s4905_s2 + $0x2a0] sm:$0xf]  ;;  %1827 = vmatpush.bf16.msra.mxu3 %v2725_v13  ;;  %v3283_v13 = vld [vmem:[%s4905_s2 + $0x3c4] sm:$0xf0] }
  0xa0   :  { %v2861_v25 = vor.u32 %v3247_v14, %v2860_v12  ;;  %v3004_v12 = vld [vmem:[%s4905_s2 + $0x3c0] sm:$0xf]  ;;  %v2577_v14 = vor.u32 %v3174_v60, %v2574_v63 }
  0xa1   :  { %1789 = vmatpush.bf16.msra.mxu0 %v2525_v24  ;;  %1815 = vmatpush.bf16.msra.mxu2 %v2653_v3  ;;  %v3229_v24 = vld [vmem:[%s4905_s2 + $0x214] sm:$0xf0]  ;;  %v3190_v3 = vld [vmem:[%s4905_s2 + $0xe4] sm:$0xf]  ;;  %v3005_v21 = vor.u32 %v3283_v13, %v3004_v12 }
  0xa2   :  { %v2789_v1 = vor.u32 %v3229_v24, %v2788_v23  ;;  %v2924_v23 = vld [vmem:[%s4905_s2 + $0x320] sm:$0xf]  ;;  %v3263_v24 = vld [vmem:[%s4905_s2 + $0x324] sm:$0xf0] }
  0xa3   :  { %1802 = vmatpush.bf16.msra.mxu1 %v2589_v28  ;;  %v812_v61 = vpop.f32.mrf.mxu1  ;;  %v799_v4 = vpop.f32.mrf.mxu0  ;;  %1828 = vmatpush.bf16.msra.mxu3 %v2717_v27  ;;  %v2558_v27 = vld [vmem:[%s4905_s2 + $0x48] sm:$0xf0] }
  0xa4   :  { %v813_v8 = vadd.f32 %v812_v61, %v799_v4  ;;  %v2845_v61 = vor.u32 %v3243_v48, %v2844_v43  ;;  %v3166_v48 = vld [vmem:[%s4905_s2 + $0x24] sm:$0xf] }
  0xa5   :  { %1834 = vmatpush.bf16.msrb.mxu0 %v2837_v26  ;;  %1860 = vmatpush.bf16.msrb.mxu2 %v2965_v18  ;;  %v2852_v26 = vld [vmem:[%s4905_s2 + $0x290] sm:$0xf]  ;;  %v3188_v18 = vld [vmem:[%s4905_s2 + $0xd4] sm:$0xf]  ;;  %v2545_v63 = vor.u32 %v3166_v48, %v2542_v49  ;;  %v2678_v48 = vld [vmem:[%s4905_s2 + $0x138] sm:$0xf0] }
  0xa6   :  { %v998_v17 = vmax.f32 %v813_v8, 0.0  ;;  %v2853_v42 = vor.u32 %v3245_v29, %v2852_v26  ;;  %v2638_v8 = vld [vmem:[%s4905_s2 + $0xe8] sm:$0xf0]  ;;  %v3170_v26 = vld [vmem:[%s4905_s2 + $0x44] sm:$0xf]  ;;  %v2925_v29 = vor.u32 %v3263_v24, %v2924_v23 }
  0xa7   :  { %1847 = vmatpush.bf16.msrb.mxu1 %v2901_v33  ;;  %v2561_v34 = vor.u32 %v3170_v26, %v2558_v27  ;;  %v3162_v23 = vld [vmem:[%s4905_s2 + $0x4] sm:$0xf]  ;;  %v2526_v24 = vld [vmem:[%s4905_s2 + $0x8] sm:$0xf0] }
  0xa8   :  { %v4371_v22 = vpack.c.bf16 %v998_v17, %v998_v17  ;;  %v2641_v17 = vor.u32 %v3190_v3, %v2638_v8  ;;  %v2980_v3 = vld [vmem:[%s4905_s2 + $0x390] sm:$0xf]  ;;  %v2534_v8 = vld [vmem:[%s4905_s2 + $0x18] sm:$0xf0]  ;;  %v3178_v27 = vld [vmem:[%s4905_s2 + $0x84] sm:$0xf] }
  0xa9   :  { %1835 = vmatpush.bf16.msrb.mxu0 %v2829_v39  ;;  %v3176_v39 = vld [vmem:[%s4905_s2 + $0x74] sm:$0xf]  ;;  %1861 = vmatpush.bf16.msrb.mxu2 %v2957_v36 }
  0xaa   :  { %1790 = vmatmul.bf16.vlgmr.msra.gmra.mxu0 %v4371_v22  ;;  %v2585_v59 = vor.u32 %v3176_v39, %v2582_v40  ;;  %v2916_v39 = vld [vmem:[%s4905_s2 + $0x310] sm:$0xf]  ;;  %v3261_v40 = vld [vmem:[%s4905_s2 + $0x314] sm:$0xf0] }
  0xab   :  { %1848 = vmatpush.bf16.msrb.mxu1 %v2893_v2  ;;  %v814_v28 = vpop.f32.mrf.mxu1  ;;  %v825_v32 = vpop.f32.mrf.mxu2  ;;  %v3289_v2 = vld [vmem:[%s4905_s2 + $0x3f4] sm:$0xf0]  ;;  %v2917_v43 = vor.u32 %v3261_v40, %v2916_v39 }
  0xac   :  { %v838_v33 = vpop.f32.mrf.mxu3  ;;  %v801_v38 = vpop.f32.mrf.mxu0  ;;  %v2633_v28 = vor.u32 %v3188_v18, %v2630_v20  ;;  %v2972_v18 = vld [vmem:[%s4905_s2 + $0x380] sm:$0xf] }
  0xad   :  { %1836 = vmatpush.bf16.msrb.mxu0 %v2821_v44  ;;  %v839_v37 = vadd.f32 %v838_v33, %v825_v32  ;;  %v3029_v44 = vor.u32 %v3289_v2, %v3028_v41  ;;  %1862 = vmatpush.bf16.msrb.mxu2 %v2949_v50  ;;  %v2996_v32 = vld [vmem:[%s4905_s2 + $0x3b0] sm:$0xf]  ;;  %v3281_v33 = vld [vmem:[%s4905_s2 + $0x3b4] sm:$0xf0]  ;;  %v2550_v38 = vld [vmem:[%s4905_s2 + $0x38] sm:$0xf0]  ;;  %v2989_v50 = vor.u32 %v3279_v46, %v2988_v45 }
  0xae   :  { %v2997_v36 = vor.u32 %v3281_v33, %v2996_v32  ;;  %v3184_v2 = vld [vmem:[%s4905_s2 + $0xb4] sm:$0xf]  ;;  %v2758_v45 = vld [vmem:[%s4905_s2 + $0x1d8] sm:$0xf0] }
  0xaf   :  { %1849 = vmatpush.bf16.msrb.mxu1 %v2885_v47  ;;  %v999_v47 = vmax.f32 %v839_v37, 0.0  ;;  %1873 = vmatpush.bf16.msrb.mxu3 %v3029_v44  ;;  %v3204_v33 = vld [vmem:[%s4905_s2 + $0x154] sm:$0xf] }
  0xb1   :  { %1837 = vmatpush.bf16.msrb.mxu0 %v2813_v53  ;;  %v3287_v53 = vld [vmem:[%s4905_s2 + $0x3e4] sm:$0xf0]  ;;  %v4434_v54 = vpack.c.bf16 %v999_v47, %v999_v47  ;;  %v2553_v47 = vor.u32 %v3168_v35, %v2550_v38  ;;  %v3222_v38 = vld [vmem:[%s4905_s2 + $0x1e4] sm:$0xf] }
  0xb2   :  { %v3021_v56 = vor.u32 %v3287_v53, %v3020_v52  ;;  %v2908_v53 = vld [vmem:[%s4905_s2 + $0x300] sm:$0xf] }
  0xb3   :  { %1850 = vmatpush.bf16.msrb.mxu1 %v2877_v58  ;;  %v3267_v58 = vld [vmem:[%s4905_s2 + $0x344] sm:$0xf0]  ;;  %v827_v6 = vpop.f32.mrf.mxu2 }
  0xb4   :  { %1803 = vmatmul.bf16.vlgmr.msra.gmra.mxu1 %v4434_v54  ;;  %v2941_v4 = vor.u32 %v3267_v58, %v2940_v57  ;;  %v840_v7 = vpop.f32.mrf.mxu3  ;;  %1874 = vmatpush.bf16.msrb.mxu3 %v3021_v56  ;;  %v3182_v56 = vld [vmem:[%s4905_s2 + $0xa4] sm:$0xf]  ;;  %v2606_v57 = vld [vmem:[%s4905_s2 + $0xa8] sm:$0xf0] }
  0xb5   :  { %1838 = vmatpush.bf16.msrb.mxu0 %v2805_v5  ;;  %v3285_v5 = vld [vmem:[%s4905_s2 + $0x3d4] sm:$0xf0]  ;;  %v3164_v7 = vld [vmem:[%s4905_s2 + $0x14] sm:$0xf] }
  0xb6   :  { %v3013_v9 = vor.u32 %v3285_v5, %v3012_v62  ;;  %1863 = vmatpush.bf16.msrb.mxu2 %v2941_v4  ;;  %v3277_v4 = vld [vmem:[%s4905_s2 + $0x394] sm:$0xf0] }
  0xb7   :  { %1851 = vmatpush.bf16.msrb.mxu1 %v2869_v11  ;;  %v3265_v11 = vld [vmem:[%s4905_s2 + $0x334] sm:$0xf0] }
  0xb8   :  { %1875 = vmatpush.bf16.msrb.mxu3 %v3013_v9  ;;  %v2609_v9 = vor.u32 %v3182_v56, %v2606_v57  ;;  %v3216_v57 = vld [vmem:[%s4905_s2 + $0x1b4] sm:$0xf] }
  0xb9   :  { %1839 = vmatpush.bf16.msrb.mxu0 %v2797_v19  ;;  %v2933_v19 = vor.u32 %v3265_v11, %v2932_v10  ;;  %v2981_v10 = vor.u32 %v3277_v4, %v2980_v3  ;;  %v3180_v11 = vld [vmem:[%s4905_s2 + $0x94] sm:$0xf]  ;;  %v3214_v4 = vld [vmem:[%s4905_s2 + $0x1a4] sm:$0xf] }
  0xbb   :  { %1852 = vmatpush.bf16.msrb.mxu1 %v2861_v25  ;;  %v2569_v25 = vor.u32 %v3172_v15, %v2566_v16  ;;  %1864 = vmatpush.bf16.msrb.mxu2 %v2933_v19  ;;  %v3206_v15 = vld [vmem:[%s4905_s2 + $0x164] sm:$0xf]  ;;  %v2702_v16 = vld [vmem:[%s4905_s2 + $0x168] sm:$0xf0]  ;;  %v3275_v19 = vld [vmem:[%s4905_s2 + $0x384] sm:$0xf0] }
  0xbc   :  { %1876 = vmatpush.bf16.msrb.mxu3 %v3005_v21  ;;  %v2537_v21 = vor.u32 %v3164_v7, %v2534_v8  ;;  %v3240_v7 = vld [vmem:[%s4905_s2 + $0x274] sm:$0xf]  ;;  %v2838_v8 = vld [vmem:[%s4905_s2 + $0x278] sm:$0xf0] }
  0xbd   :  { %1840 = vmatpush.bf16.msrb.mxu0 %v2789_v1  ;;  %v2625_v1 = vor.u32 %v3186_v30, %v2622_v31  ;;  %v2590_v31 = vld [vmem:[%s4905_s2 + $0x88] sm:$0xf0] }
  0xbe   :  { %v2593_v40 = vor.u32 %v3178_v27, %v2590_v31  ;;  %v3210_v31 = vld [vmem:[%s4905_s2 + $0x184] sm:$0xf] }
  0xbf   :  { %1853 = vmatpush.bf16.msrb.mxu1 %v2853_v42  ;;  %1865 = vmatpush.bf16.msrb.mxu2 %v2925_v29  ;;  %v2614_v42 = vld [vmem:[%s4905_s2 + $0xb8] sm:$0xf0] }
  0xc0   :  { %1877 = vmatpush.bf16.msrb.mxu3 %v2997_v36  ;;  %v2617_v52 = vor.u32 %v3184_v2, %v2614_v42  ;;  %v2774_v29 = vld [vmem:[%s4905_s2 + $0x1f8] sm:$0xf0]  ;;  %v3202_v2 = vld [vmem:[%s4905_s2 + $0x144] sm:$0xf]  ;;  %v2686_v42 = vld [vmem:[%s4905_s2 + $0x148] sm:$0xf0] }
  0xc1   :  { %1841 = vmatpush.bf16.msrb.mxu0 %v2781_v55  ;;  %v851_v37 = vpop.f32.mrf.mxu0  ;;  %v3259_v55 = vld [vmem:[%s4905_s2 + $0x304] sm:$0xf0] }
  0xc2   :  { %v2909_v58 = vor.u32 %v3259_v55, %v2908_v53  ;;  %v3198_v53 = vld [vmem:[%s4905_s2 + $0x124] sm:$0xf]  ;;  %v2670_v55 = vld [vmem:[%s4905_s2 + $0x128] sm:$0xf0] }
  0xc3   :  { %1854 = vmatpush.bf16.msrb.mxu1 %v2845_v61  ;;  %v864_v41 = vpop.f32.mrf.mxu1  ;;  %1866 = vmatpush.bf16.msrb.mxu2 %v2917_v43  ;;  %v2710_v61 = vld [vmem:[%s4905_s2 + $0x178] sm:$0xf0]  ;;  %v2689_v43 = vor.u32 %v3202_v2, %v2686_v42  ;;  %v2673_v56 = vor.u32 %v3198_v53, %v2670_v55  ;;  %v2814_v2 = vld [vmem:[%s4905_s2 + $0x248] sm:$0xf0]  ;;  %v3230_v55 = vld [vmem:[%s4905_s2 + $0x224] sm:$0xf] }
  0xc4   :  { %v865_v44 = vadd.f32 %v864_v41, %v851_v37  ;;  %1878 = vmatpush.bf16.msrb.mxu3 %v2989_v50  ;;  %v2529_v37 = vor.u32 %v3162_v23, %v2526_v24  ;;  %v3218_v50 = vld [vmem:[%s4905_s2 + $0x1c4] sm:$0xf]  ;;  %v3256_v24 = vld [vmem:[%s4905_s2 + $0x2f4] sm:$0xf]  ;;  %v2878_v53 = vld [vmem:[%s4905_s2 + $0x2c8] sm:$0xf0] }
  0xc5   :  { %1886 = vmatpush.bf16.msra.mxu0 %v2585_v59  ;;  %v3208_v59 = vld [vmem:[%s4905_s2 + $0x174] sm:$0xf] }
  0xc6   :  { %v1000_v51 = vmax.f32 %v865_v44, 0.0  ;;  %v3220_v44 = vld [vmem:[%s4905_s2 + $0x1d4] sm:$0xf] }
  0xc7   :  { %1899 = vmatpush.bf16.msra.mxu1 %v2649_v0  ;;  %v877_v62 = vpop.f32.mrf.mxu2  ;;  %v2713_v0 = vor.u32 %v3208_v59, %v2710_v61  ;;  %1867 = vmatpush.bf16.msrb.mxu2 %v2909_v58  ;;  %v2761_v46 = vor.u32 %v3220_v44, %v2758_v45  ;;  %v2742_v58 = vld [vmem:[%s4905_s2 + $0x1b8] sm:$0xf0]  ;;  %v3196_v61 = vld [vmem:[%s4905_s2 + $0x114] sm:$0xf] }
  0xc8   :  { %v4554_v60 = vpack.c.bf16 %v1000_v51, %v1000_v51  ;;  %1879 = vmatpush.bf16.msrb.mxu3 %v2981_v10  ;;  %v2750_v51 = vld [vmem:[%s4905_s2 + $0x1c8] sm:$0xf0]  ;;  %v2745_v59 = vor.u32 %v3216_v57, %v2742_v58  ;;  %v3194_v10 = vld [vmem:[%s4905_s2 + $0x104] sm:$0xf] }
  0xc9   :  { %1887 = vmatpush.bf16.msra.mxu0 %v2577_v14  ;;  %v890_v5 = vpop.f32.mrf.mxu3  ;;  %v853_v6 = vpop.f32.mrf.mxu0  ;;  %v2598_v14 = vld [vmem:[%s4905_s2 + $0x98] sm:$0xf0] }
  0xca   :  { %1816 = vmatmul.bf16.vlgmr.msra.gmra.mxu2 %v4554_v60  ;;  %v891_v12 = vadd.f32 %v890_v5, %v877_v62  ;;  %v2601_v26 = vor.u32 %v3180_v11, %v2598_v14  ;;  %v2662_v62 = vld [vmem:[%s4905_s2 + $0x118] sm:$0xf0]  ;;  %v2734_v5 = vld [vmem:[%s4905_s2 + $0x1a8] sm:$0xf0]  ;;  %v2841_v14 = vor.u32 %v3240_v7, %v2838_v8  ;;  %v3226_v7 = vld [vmem:[%s4905_s2 + $0x204] sm:$0xf] }
  0xcb   :  { %1900 = vmatpush.bf16.msra.mxu1 %v2641_v17  ;;  %v866_v13 = vpop.f32.mrf.mxu1  ;;  %1912 = vmatpush.bf16.msra.mxu2 %v2713_v0  ;;  %v2705_v17 = vor.u32 %v3206_v15, %v2702_v16  ;;  %v2665_v0 = vor.u32 %v3196_v61, %v2662_v62  ;;  %v2654_v11 = vld [vmem:[%s4905_s2 + $0x108] sm:$0xf0]  ;;  %v3212_v15 = vld [vmem:[%s4905_s2 + $0x194] sm:$0xf]  ;;  %v2726_v16 = vld [vmem:[%s4905_s2 + $0x198] sm:$0xf0] }
  0xcc   :  { %v1001_v20 = vmax.f32 %v891_v12, 0.0  ;;  %v2657_v13 = vor.u32 %v3194_v10, %v2654_v11  ;;  %v2870_v61 = vld [vmem:[%s4905_s2 + $0x2b8] sm:$0xf0]  ;;  %v3228_v62 = vld [vmem:[%s4905_s2 + $0x214] sm:$0xf] }
  0xcd   :  { %1888 = vmatpush.bf16.msra.mxu0 %v2569_v25  ;;  %v2973_v25 = vor.u32 %v3275_v19, %v2972_v18  ;;  %v3238_v18 = vld [vmem:[%s4905_s2 + $0x264] sm:$0xf]  ;;  %v2830_v19 = vld [vmem:[%s4905_s2 + $0x268] sm:$0xf0]  ;;  %v3272_v10 = vld [vmem:[%s4905_s2 + $0x374] sm:$0xf] }
  0xce   :  { %v4605_v30 = vpack.c.bf16 %v1001_v20, %v1001_v20  ;;  %v2729_v20 = vor.u32 %v3212_v15, %v2726_v16  ;;  %v2833_v27 = vor.u32 %v3238_v18, %v2830_v19  ;;  %v2782_v8 = vld [vmem:[%s4905_s2 + $0x208] sm:$0xf0]  ;;  %v2966_v11 = vld [vmem:[%s4905_s2 + $0x378] sm:$0xf0]  ;;  %v3244_v15 = vld [vmem:[%s4905_s2 + $0x294] sm:$0xf] }
  0xcf   :  { %1901 = vmatpush.bf16.msra.mxu1 %v2633_v28  ;;  %v3224_v28 = vld [vmem:[%s4905_s2 + $0x1f4] sm:$0xf]  ;;  %1913 = vmatpush.bf16.msra.mxu2 %v2705_v17  ;;  %v879_v36 = vpop.f32.mrf.mxu2  ;;  %v2969_v16 = vor.u32 %v3272_v10, %v2966_v11  ;;  %v3270_v19 = vld [vmem:[%s4905_s2 + $0x364] sm:$0xf] }
  0xd0   :  { %v2777_v32 = vor.u32 %v3224_v28, %v2774_v29  ;;  %1880 = vmatpush.bf16.msrb.mxu3 %v2973_v25  ;;  %v2902_v28 = vld [vmem:[%s4905_s2 + $0x2f8] sm:$0xf0]  ;;  %v3274_v11 = vld [vmem:[%s4905_s2 + $0x384] sm:$0xf] }
  0xd1   :  { %1889 = vmatpush.bf16.msra.mxu0 %v2561_v34  ;;  %v2694_v34 = vld [vmem:[%s4905_s2 + $0x158] sm:$0xf0]  ;;  %1829 = vmatmul.bf16.vlgmr.msra.gmra.mxu3 %v4605_v30  ;;  %v892_v39 = vpop.f32.mrf.mxu3 }
  0xd2   :  { %v2697_v35 = vor.u32 %v3204_v33, %v2694_v34  ;;  %v3236_v33 = vld [vmem:[%s4905_s2 + $0x254] sm:$0xf]  ;;  %v2822_v34 = vld [vmem:[%s4905_s2 + $0x258] sm:$0xf0]  ;;  %v3254_v39 = vld [vmem:[%s4905_s2 + $0x2e4] sm:$0xf] }
  0xd3   :  { %1902 = vmatpush.bf16.msra.mxu1 %v2625_v1  ;;  %v2766_v1 = vld [vmem:[%s4905_s2 + $0x1e8] sm:$0xf0] }
  0xd4   :  { %1925 = vmatpush.bf16.msra.mxu3 %v2777_v32  ;;  %v2769_v41 = vor.u32 %v3222_v38, %v2766_v1  ;;  %1914 = vmatpush.bf16.msra.mxu2 %v2697_v35  ;;  %v2718_v32 = vld [vmem:[%s4905_s2 + $0x188] sm:$0xf0]  ;;  %v2825_v1 = vor.u32 %v3236_v33, %v2822_v34  ;;  %v3030_v33 = vld [vmem:[%s4905_s2 + $0x3f8] sm:$0xf0]  ;;  %v3268_v34 = vld [vmem:[%s4905_s2 + $0x354] sm:$0xf] }
  0xd5   :  { %1890 = vmatpush.bf16.msra.mxu0 %v2553_v47  ;;  %v3200_v47 = vld [vmem:[%s4905_s2 + $0x134] sm:$0xf]  ;;  %v2721_v35 = vor.u32 %v3210_v31, %v2718_v32 }
  0xd6   :  { %v2681_v49 = vor.u32 %v3200_v47, %v2678_v48  ;;  %v2886_v47 = vld [vmem:[%s4905_s2 + $0x2d8] sm:$0xf0]  ;;  %v3232_v48 = vld [vmem:[%s4905_s2 + $0x234] sm:$0xf] }
  0xd7   :  { %1903 = vmatpush.bf16.msra.mxu1 %v2617_v52  ;;  %v2753_v52 = vor.u32 %v3218_v50, %v2750_v51  ;;  %v3288_v32 = vld [vmem:[%s4905_s2 + $0x3f4] sm:$0xf] }
  0xd8   :  { %1926 = vmatpush.bf16.msra.mxu3 %v2769_v41  ;;  %1915 = vmatpush.bf16.msra.mxu2 %v2689_v43  ;;  %v3234_v41 = vld [vmem:[%s4905_s2 + $0x244] sm:$0xf] }
  0xd9   :  { %1891 = vmatpush.bf16.msra.mxu0 %v2545_v63  ;;  %v2817_v45 = vor.u32 %v3234_v41, %v2814_v2  ;;  %v3286_v41 = vld [vmem:[%s4905_s2 + $0x3e4] sm:$0xf]  ;;  %v3022_v2 = vld [vmem:[%s4905_s2 + $0x3e8] sm:$0xf0] }
  0xdb   :  { %1904 = vmatpush.bf16.msra.mxu1 %v2609_v9  ;;  %v2737_v9 = vor.u32 %v3214_v4, %v2734_v5  ;;  %v3246_v4 = vld [vmem:[%s4905_s2 + $0x2a4] sm:$0xf]  ;;  %v2862_v5 = vld [vmem:[%s4905_s2 + $0x2a8] sm:$0xf0] }
  0xdc   :  { %1927 = vmatpush.bf16.msra.mxu3 %v2761_v46  ;;  %1916 = vmatpush.bf16.msra.mxu2 %v2681_v49  ;;  %v3252_v46 = vld [vmem:[%s4905_s2 + $0x2d4] sm:$0xf]  ;;  %v2806_v49 = vld [vmem:[%s4905_s2 + $0x238] sm:$0xf0] }
  0xdd   :  { %1892 = vmatpush.bf16.msra.mxu0 %v2537_v21  ;;  %v2889_v50 = vor.u32 %v3252_v46, %v2886_v47  ;;  %v2809_v51 = vor.u32 %v3232_v48, %v2806_v49  ;;  %v3284_v47 = vld [vmem:[%s4905_s2 + $0x3d4] sm:$0xf]  ;;  %v3014_v48 = vld [vmem:[%s4905_s2 + $0x3d8] sm:$0xf0] }
  0xde   :  { %v3264_v49 = vld [vmem:[%s4905_s2 + $0x334] sm:$0xf] }
  0xdf   :  { %1905 = vmatpush.bf16.msra.mxu1 %v2601_v26 }
  0xe0   :  { %1928 = vmatpush.bf16.msra.mxu3 %v2753_v52  ;;  %1917 = vmatpush.bf16.msra.mxu2 %v2673_v56  ;;  %v3250_v52 = vld [vmem:[%s4905_s2 + $0x2c4] sm:$0xf]  ;;  %v2798_v56 = vld [vmem:[%s4905_s2 + $0x228] sm:$0xf0] }
  0xe1   :  { %1893 = vmatpush.bf16.msra.mxu0 %v2529_v37  ;;  %v903_v63 = vpop.f32.mrf.mxu0  ;;  %v2905_v37 = vor.u32 %v3256_v24, %v2902_v28  ;;  %v2881_v57 = vor.u32 %v3250_v52, %v2878_v53  ;;  %v2801_v58 = vor.u32 %v3230_v55, %v2798_v56  ;;  %v3282_v53 = vld [vmem:[%s4905_s2 + $0x3c4] sm:$0xf]  ;;  %v2926_v56 = vld [vmem:[%s4905_s2 + $0x328] sm:$0xf0] }
  0xe2   :  { %v3262_v55 = vld [vmem:[%s4905_s2 + $0x324] sm:$0xf] }
  0xe3   :  { %1906 = vmatpush.bf16.msra.mxu1 %v2593_v40  ;;  %v916_v3 = vpop.f32.mrf.mxu1  ;;  %v2894_v40 = vld [vmem:[%s4905_s2 + $0x2e8] sm:$0xf0] }
  0xe4   :  { %v917_v6 = vadd.f32 %v916_v3, %v903_v63  ;;  %1929 = vmatpush.bf16.msra.mxu3 %v2745_v59  ;;  %1918 = vmatpush.bf16.msra.mxu2 %v2665_v0  ;;  %v2897_v43 = vor.u32 %v3254_v39, %v2894_v40  ;;  %v3248_v59 = vld [vmem:[%s4905_s2 + $0x2b4] sm:$0xf]  ;;  %v2790_v63 = vld [vmem:[%s4905_s2 + $0x218] sm:$0xf0] }
  0xe5   :  { %v2793_v3 = vor.u32 %v3228_v62, %v2790_v63  ;;  %v3260_v62 = vld [vmem:[%s4905_s2 + $0x314] sm:$0xf]  ;;  %v2918_v63 = vld [vmem:[%s4905_s2 + $0x318] sm:$0xf0] }
  0xe6   :  { %v1002_v12 = vmax.f32 %v917_v6, 0.0 }
  0xe7   :  { %v929_v21 = vpop.f32.mrf.mxu2 }
  0xe8   :  { %v4689_v17 = vpack.c.bf16 %v1002_v12, %v1002_v12  ;;  %1930 = vmatpush.bf16.msra.mxu3 %v2737_v9  ;;  %1919 = vmatpush.bf16.msra.mxu2 %v2657_v13  ;;  %v2865_v12 = vor.u32 %v3246_v4, %v2862_v5  ;;  %v3258_v4 = vld [vmem:[%s4905_s2 + $0x304] sm:$0xf]  ;;  %v2910_v5 = vld [vmem:[%s4905_s2 + $0x308] sm:$0xf0] }
  0xe9   :  { %v942_v23 = vpop.f32.mrf.mxu3  ;;  %v905_v25 = vpop.f32.mrf.mxu0 }
  0xea   :  { %1842 = vmatmul.bf16.vlgmr.msrb.gmra.mxu0 %v4689_v17  ;;  %v943_v26 = vadd.f32 %v942_v23, %v929_v21 }
  0xeb   :  { %1938 = vmatpush.bf16.msrb.mxu0 %v2841_v14  ;;  %v918_v29 = vpop.f32.mrf.mxu1  ;;  %v2785_v14 = vor.u32 %v3226_v7, %v2782_v8  ;;  %v2913_v7 = vor.u32 %v3258_v4, %v2910_v5  ;;  %v3276_v8 = vld [vmem:[%s4905_s2 + $0x394] sm:$0xf] }
  0xec   :  { %1931 = vmatpush.bf16.msra.mxu3 %v2729_v20  ;;  %v1003_v36 = vmax.f32 %v943_v26, 0.0  ;;  %v2958_v20 = vld [vmem:[%s4905_s2 + $0x368] sm:$0xf0]  ;;  %v3242_v26 = vld [vmem:[%s4905_s2 + $0x284] sm:$0xf] }
  0xed   :  { %v2961_v31 = vor.u32 %v3270_v19, %v2958_v20 }
  0xee   :  { %v4716_v38 = vpack.c.bf16 %v1003_v36, %v1003_v36 }
  0xef   :  { %1939 = vmatpush.bf16.msrb.mxu0 %v2833_v27  ;;  %v931_v42 = vpop.f32.mrf.mxu2  ;;  %v2846_v27 = vld [vmem:[%s4905_s2 + $0x288] sm:$0xf0] }
  0xf0   :  { %1932 = vmatpush.bf16.msra.mxu3 %v2721_v35  ;;  %1855 = vmatmul.bf16.vlgmr.msrb.gmra.mxu1 %v4716_v38  ;;  %v2950_v35 = vld [vmem:[%s4905_s2 + $0x358] sm:$0xf0]  ;;  %v3266_v42 = vld [vmem:[%s4905_s2 + $0x344] sm:$0xf] }
  0xf1   :  { %1951 = vmatpush.bf16.msrb.mxu1 %v2905_v37  ;;  %v944_v44 = vpop.f32.mrf.mxu3  ;;  %v2849_v37 = vor.u32 %v3242_v26, %v2846_v27  ;;  %v2953_v40 = vor.u32 %v3268_v34, %v2950_v35 }
  0xf3   :  { %1940 = vmatpush.bf16.msrb.mxu0 %v2825_v1  ;;  %v3033_v1 = vor.u32 %v3288_v32, %v3030_v33 }
  0xf5   :  { %1952 = vmatpush.bf16.msrb.mxu1 %v2897_v43 }
  0xf7   :  { %1941 = vmatpush.bf16.msrb.mxu0 %v2817_v45  ;;  %v3025_v45 = vor.u32 %v3286_v41, %v3022_v2 }
  0xf9   :  { %1953 = vmatpush.bf16.msrb.mxu1 %v2889_v50  ;;  %v2934_v50 = vld [vmem:[%s4905_s2 + $0x338] sm:$0xf0] }
  0xfa   :  { %1894 = vmatmul.bf16.vlgmr.msra.gmra.mxu0 %v4371_v22  ;;  %v2873_v22 = vor.u32 %v3248_v59, %v2870_v61  ;;  %v2937_v52 = vor.u32 %v3264_v49, %v2934_v50  ;;  %v3280_v59 = vld [vmem:[%s4905_s2 + $0x3b4] sm:$0xf]  ;;  %v2998_v61 = vld [vmem:[%s4905_s2 + $0x3b8] sm:$0xf0] }
  0xfb   :  { %1942 = vmatpush.bf16.msrb.mxu0 %v2809_v51  ;;  %v3017_v51 = vor.u32 %v3284_v47, %v3014_v48 }
  0xfd   :  { %1954 = vmatpush.bf16.msrb.mxu1 %v2881_v57 }
  0xff   :  { %1943 = vmatpush.bf16.msrb.mxu0 %v2801_v58  ;;  %v2929_v58 = vor.u32 %v3262_v55, %v2926_v56 }
 0x100   :  { %1907 = vmatmul.bf16.vlgmr.msra.gmra.mxu1 %v4434_v54  ;;  %v2854_v54 = vld [vmem:[%s4905_s2 + $0x298] sm:$0xf0] }
 0x101   :  { %v955_v0 = vpop.f32.mrf.mxu0  ;;  %1955 = vmatpush.bf16.msrb.mxu1 %v2873_v22  ;;  %v2857_v23 = vor.u32 %v3244_v15, %v2854_v54  ;;  %v2921_v22 = vor.u32 %v3260_v62, %v2918_v63 }
 0x103   :  { %v968_v6 = vpop.f32.mrf.mxu1  ;;  %1944 = vmatpush.bf16.msrb.mxu0 %v2793_v3  ;;  %v2990_v3 = vld [vmem:[%s4905_s2 + $0x3a8] sm:$0xf0] }
 0x104   :  { %v969_v9 = vadd.f32 %v968_v6, %v955_v0  ;;  %v3278_v0 = vld [vmem:[%s4905_s2 + $0x3a4] sm:$0xf] }
 0x105   :  { %1956 = vmatpush.bf16.msrb.mxu1 %v2865_v12  ;;  %v2993_v6 = vor.u32 %v3278_v0, %v2990_v3 }
 0x106   :  { %v1004_v13 = vmax.f32 %v969_v9, 0.0  ;;  %v2982_v9 = vld [vmem:[%s4905_s2 + $0x398] sm:$0xf0] }
 0x107   :  { %v981_v21 = vpop.f32.mrf.mxu2  ;;  %1945 = vmatpush.bf16.msrb.mxu0 %v2785_v14  ;;  %v2985_v10 = vor.u32 %v3276_v8, %v2982_v9 }
 0x108   :  { %v4793_v18 = vpack.c.bf16 %v1004_v13, %v1004_v13 }
 0x109   :  { %v994_v24 = vpop.f32.mrf.mxu3  ;;  %v957_v25 = vpop.f32.mrf.mxu0  ;;  %1957 = vmatpush.bf16.msrb.mxu1 %v2857_v23 }
 0x10a   :  { %1868 = vmatmul.bf16.vlgmr.msrb.gmra.mxu2 %v4793_v18  ;;  %v995_v28 = vadd.f32 %v994_v24, %v981_v21  ;;  %1946 = vmatmul.bf16.vlgmr.msrb.gmra.mxu0 %v4689_v17  ;;  %v2942_v17 = vld [vmem:[%s4905_s2 + $0x348] sm:$0xf0] }
 0x10b   :  { %v970_v29 = vpop.f32.mrf.mxu1  ;;  %1964 = vmatpush.bf16.msrb.mxu2 %v2969_v16  ;;  %v2945_v46 = vor.u32 %v3266_v42, %v2942_v17 }
 0x10c   :  { %v1005_v36 = vmax.f32 %v995_v28, 0.0 }
 0x10d   :  { %1958 = vmatpush.bf16.msrb.mxu1 %v2849_v37 }
 0x10e   :  { %v1013_v39 = vpack.c.bf16 %v1005_v36, %v1005_v36 }
 0x10f   :  { %1965 = vmatpush.bf16.msrb.mxu2 %v2961_v31  ;;  %v983_v43 = vpop.f32.mrf.mxu2 }
 0x110   :  { %1881 = vmatmul.bf16.vlgmr.msrb.gmra.mxu3 %v1013_v39  ;;  %1959 = vmatmul.bf16.vlgmr.msrb.gmra.mxu1 %v4716_v38  ;;  %v3006_v38 = vld [vmem:[%s4905_s2 + $0x3c8] sm:$0xf0] }
 0x111   :  { %v996_v44 = vpop.f32.mrf.mxu3  ;;  %1977 = vmatpush.bf16.msrb.mxu3 %v3033_v1  ;;  %v3009_v57 = vor.u32 %v3282_v53, %v3006_v38 }
 0x113   :  { %1966 = vmatpush.bf16.msrb.mxu2 %v2953_v40 }
 0x115   :  { %1978 = vmatpush.bf16.msrb.mxu3 %v3025_v45 }
 0x117   :  { %1967 = vmatpush.bf16.msrb.mxu2 %v2945_v46 }
 0x119   :  { %1979 = vmatpush.bf16.msrb.mxu3 %v3017_v51 }
 0x11a   :  { %1920 = vmatmul.bf16.vlgmr.msra.gmra.mxu2 %v4554_v60  ;;  %v3001_v60 = vor.u32 %v3280_v59, %v2998_v61 }
 0x11b   :  { %1968 = vmatpush.bf16.msrb.mxu2 %v2937_v52 }
 0x11d   :  { %1980 = vmatpush.bf16.msrb.mxu3 %v3009_v57 }
 0x11f   :  { %1969 = vmatpush.bf16.msrb.mxu2 %v2929_v58 }
 0x120   :  { %1933 = vmatmul.bf16.vlgmr.msra.gmra.mxu3 %v4605_v30  ;;  %v2974_v30 = vld [vmem:[%s4905_s2 + $0x388] sm:$0xf0] }
 0x121   :  { %1981 = vmatpush.bf16.msrb.mxu3 %v3001_v60  ;;  %v2977_v12 = vor.u32 %v3274_v11, %v2974_v30 }
 0x123   :  { %1970 = vmatpush.bf16.msrb.mxu2 %v2921_v22 }
 0x125   :  { %1982 = vmatpush.bf16.msrb.mxu3 %v2993_v6 }
 0x127   :  { %1971 = vmatpush.bf16.msrb.mxu2 %v2913_v7  ;;  %v1791_v13 = vpop.f32.mrf.mxu0 }
 0x129   :  { %1983 = vmatpush.bf16.msrb.mxu3 %v2985_v10 }
 0x12a   :  { %1972 = vmatmul.bf16.vlgmr.msrb.gmra.mxu2 %v4793_v18 }
 0x12d   :  { %1984 = vmatpush.bf16.msrb.mxu3 %v2977_v12 }
 0x12f   :  { %v1793_v54 = vpop.f32.mrf.mxu0 }
 0x130   :  { %1985 = vmatmul.bf16.vlgmr.msrb.gmra.mxu3 %v1013_v39 }
 0x131   :  { %v1804_v14 = vpop.f32.mrf.mxu1 }
 0x132   :  { %v1805_v15 = vadd.f32 %v1804_v14, %v1791_v13 }
 0x139   :  { %v1806_v16 = vpop.f32.mrf.mxu1 }
 0x14d   :  { %v1817_v19 = vpop.f32.mrf.mxu2 }
 0x14e   :  { %v1818_v33 = vadd.f32 %v1817_v19, %v1805_v15 }
 0x154   :  { %v1830_v20 = vpop.f32.mrf.mxu3 }
 0x155   :  { %v1819_v21 = vpop.f32.mrf.mxu2  ;;  %v1831_v34 = vadd.f32 %v1830_v20, %v1818_v33 }
 0x15c   :  { %v1832_v23 = vpop.f32.mrf.mxu3 }
 0x167   :  { %v1843_v24 = vpop.f32.mrf.mxu0 }
 0x168   :  { %v1844_v36 = vadd.f32 %v1843_v24, %v1831_v34 }
 0x16d   :  { %v1856_v25 = vpop.f32.mrf.mxu1 }
 0x16e   :  { %v1857_v37 = vadd.f32 %v1856_v25, %v1844_v36 }
 0x16f   :  { %v1845_v26 = vpop.f32.mrf.mxu0 }
 0x175   :  { %v1858_v27 = vpop.f32.mrf.mxu1 }
 0x177   :  { %v1895_v28 = vpop.f32.mrf.mxu0 }
 0x17d   :  { %v1908_v29 = vpop.f32.mrf.mxu1 }
 0x17e   :  { %v1909_v46 = vadd.f32 %v1908_v29, %v1895_v28 }
 0x17f   :  { %v1897_v31 = vpop.f32.mrf.mxu0 }
 0x185   :  { %v1910_v18 = vpop.f32.mrf.mxu1 }
 0x187   :  { %v1947_v32 = vpop.f32.mrf.mxu0 }
 0x18d   :  { %v1869_v35 = vpop.f32.mrf.mxu2  ;;  %v1960_v1 = vpop.f32.mrf.mxu1 }
 0x18e   :  { %v1870_v40 = vadd.f32 %v1869_v35, %v1857_v37 }
 0x18f   :  { %v1949_v39 = vpop.f32.mrf.mxu0 }
 0x193   :  { %v1882_v41 = vpop.f32.mrf.mxu3 }
 0x194   :  { %v1883_v2 = vadd.f32 %v1882_v41, %v1870_v40 }
 0x195   :  { %v1871_v42 = vpop.f32.mrf.mxu2  ;;  %v1962_v17 = vpop.f32.mrf.mxu1 }
 0x196   :  { %1994 = vst [vmem:[%s4906_s3] sm:$0xff] %v1883_v2 }
 0x19b   :  { %v1884_v43 = vpop.f32.mrf.mxu3 }
 0x19d   :  { %v1921_v44 = vpop.f32.mrf.mxu2 }
 0x19e   :  { %v1922_v48 = vadd.f32 %v1921_v44, %v1909_v46 }
 0x1a3   :  { %v1934_v45 = vpop.f32.mrf.mxu3 }
 0x1a4   :  { %v1935_v49 = vadd.f32 %v1934_v45, %v1922_v48 }
 0x1a5   :  { %v1923_v47 = vpop.f32.mrf.mxu2 }
 0x1a6   :  { %v1948_v51 = vadd.f32 %v1947_v32, %v1935_v49 }
 0x1a8   :  { %v1961_v53 = vadd.f32 %v1960_v1, %v1948_v51 }
 0x1ab   :  { %v1936_v50 = vpop.f32.mrf.mxu3 }
 0x1ad   :  { %v1973_v52 = vpop.f32.mrf.mxu2 }
 0x1ae   :  { %v1974_v38 = vadd.f32 %v1973_v52, %v1961_v53 }
 0x1b3   :  { %v1986_v55 = vpop.f32.mrf.mxu3 }
 0x1b4   :  { %v1987_v56 = vadd.f32 %v1986_v55, %v1974_v38 }
 0x1b5   :  { %v1975_v57 = vpop.f32.mrf.mxu2 }
 0x1b6   :  { %1995 = vst [vmem:[%s4906_s3 + $0x8] sm:$0xff] %v1987_v56 }
 0x1bb   :  { %v1988_v58 = vpop.f32.mrf.mxu3 }

</bundles_post_ra>
